<compile_context>
chip_gen: v5e
topology: v5e:2x2
jax: 0.10.0
libtpu: 0.0.40
codegen_flags: <defaults>
</compile_context>

<pallas_src>
import jax
import jax.numpy as jnp
from jax.experimental import pallas as pl
from jax.experimental.pallas import tpu as pltpu


def lstm_attn_kernel(sec_ref, w_ih_T_ref, b_ih_ref,
                     w_hh_f_T_ref, w_hh_b_T_ref,
                     w_attn_T_ref, b_attn_ref, ctx_ref,
                     sec_hidden_ref,
                     xg_f_ref, xg_b_ref, out_ref):
    S, H = sec_ref.shape
    H2 = H // 2
    G = 4 * H2

    # Fused fwd+bwd input projection, computed once (batch-independent):
    # (S, H) @ (H, 8*H2) on the MXU, bf16 operands, f32 accumulate.
    xg = jnp.dot(sec_ref[...].astype(jnp.bfloat16), w_ih_T_ref[...],
                 preferred_element_type=jnp.float32) + b_ih_ref[...]
    xg_f_ref[...] = xg[:, :G]          # time-major gate inputs, forward dir
    xg_b_ref[...] = xg[:, G:]          # time-major gate inputs, backward dir

    w_hh_f_T = w_hh_f_T_ref[...]       # (H2, 4*H2), pre-transposed in wrapper
    w_hh_b_T = w_hh_b_T_ref[...]

    def cell(g, c):                    # gate order [i, f, g, o] as in torch.nn.LSTM
        i_g = jax.nn.sigmoid(g[:, 0 * H2:1 * H2])
        f_g = jax.nn.sigmoid(g[:, 1 * H2:2 * H2])
        g_g = jnp.tanh(g[:, 2 * H2:3 * H2])
        o_g = jax.nn.sigmoid(g[:, 3 * H2:4 * H2])
        c_new = f_g * c + i_g * g_g
        h_new = o_g * jnp.tanh(c_new)
        return h_new, c_new

    def body(s, carry):
        h_f, c_f, h_b, c_b = carry
        t_b = S - 1 - s
        # forward direction at time t = s
        g_f = xg_f_ref[pl.ds(s, 1), :] + jnp.dot(
            h_f, w_hh_f_T, preferred_element_type=jnp.float32)
        h_f, c_f = cell(g_f, c_f)
        out_ref[pl.ds(s, 1), 0:H2] = h_f
        # backward direction at time t = S - 1 - s
        g_b = xg_b_ref[pl.ds(t_b, 1), :] + jnp.dot(
            h_b, w_hh_b_T, preferred_element_type=jnp.float32)
        h_b, c_b = cell(g_b, c_b)
        out_ref[pl.ds(t_b, 1), H2:H] = h_b
        return h_f, c_f, h_b, c_b

    z = jnp.zeros((1, H2), jnp.float32)
    jax.lax.fori_loop(0, S, body, (z, z, z, z), unroll=True)

    outputs = out_ref[...]                                   # (S, H) BiLSTM outputs

    # LstmAttn attention head (dropout = identity in eval mode).
    act = jnp.tanh(jnp.dot(outputs.astype(jnp.bfloat16), w_attn_T_ref[...],
                           preferred_element_type=jnp.float32) + b_attn_ref[...])
    scores = jnp.sum(act * ctx_ref[...], axis=-1, keepdims=True)   # (S, 1)
    # attention_mask is all-ones -> masked_fill is a no-op.
    m = jnp.max(scores, axis=0, keepdims=True)
    e = jnp.exp(scores - m)
    probs = e / jnp.sum(e, axis=0, keepdims=True)                  # softmax over seq
    sec_hidden_ref[...] = jnp.sum(outputs * probs, axis=0, keepdims=True)  # (1, H)


def match_kernel(fact_ref, sec_hidden_ref, w_fact_T_ref, w_sec_T_ref, b_match_ref,
                 logits_ref, scores_ref):
    # concat([fact, sec_hidden]) @ W.T split into two matmuls (no concat/transpose).
    logits = (jnp.dot(fact_ref[...].astype(jnp.bfloat16), w_fact_T_ref[...],
                      preferred_element_type=jnp.float32)
              + jnp.dot(sec_hidden_ref[...].astype(jnp.bfloat16), w_sec_T_ref[...],
                        preferred_element_type=jnp.float32)
              + b_match_ref[...])
    logits_ref[...] = logits
    scores_ref[...] = jax.nn.sigmoid(logits)


def matchnet_forward(fact, sec, params):
    B, H = fact.shape
    S = sec.shape[0]
    H2 = H // 2
    G = 4 * H2
    L = params['w_match'].shape[0]

    # --- weight preprocessing in the wrapper (fuse / pre-transpose / bf16 cast) ---
    w_ih_T = jnp.concatenate([params['w_ih_f'], params['w_ih_b']],
                             axis=0).T.astype(jnp.bfloat16)        # (H, 8*H2)
    b_ih = jnp.concatenate([params['b_f'], params['b_b']], axis=1)  # (1, 8*H2) f32
    w_hh_f_T = params['w_hh_f'].T                                   # (H2, 4*H2) f32
    w_hh_b_T = params['w_hh_b'].T
    w_attn_T = params['w_attn'].T.astype(jnp.bfloat16)              # (H, H)
    b_attn = params['b_attn']                                       # (1, H)
    ctx = params['ctx']                                             # (1, H)
    w_match_fact_T = params['w_match'][:, :H].T.astype(jnp.bfloat16)  # (H, L)
    w_match_sec_T = params['w_match'][:, H:].T.astype(jnp.bfloat16)   # (H, L)
    b_match = params['b_match']                                       # (1, L)

    vmem = lambda: pl.BlockSpec(memory_space=pltpu.MemorySpace.VMEM)

    # --- kernel 1: batch-independent BiLSTM + attention over the sections ---
    sec_hidden = pl.pallas_call(
        lstm_attn_kernel,
        out_shape=jax.ShapeDtypeStruct((1, H), jnp.float32),
        in_specs=[vmem() for _ in range(8)],
        out_specs=vmem(),
        scratch_shapes=[pltpu.VMEM((S, G), jnp.float32),   # xg forward, time-major
                        pltpu.VMEM((S, G), jnp.float32),   # xg backward, time-major
                        pltpu.VMEM((S, H), jnp.float32)],  # BiLSTM outputs, time-major
    )(sec, w_ih_T, b_ih, w_hh_f_T, w_hh_b_T, w_attn_T, b_attn, ctx)

    # --- kernel 2: batched match_fc, gridded over batch (parallel -> 2 TCs on v7x) ---
    TB = 128 if (B % 128 == 0) else B
    grid = (pl.cdiv(B, TB),)
    logits, scores = pl.pallas_call(
        match_kernel,
        out_shape=(jax.ShapeDtypeStruct((B, L), jnp.float32),
                   jax.ShapeDtypeStruct((B, L), jnp.float32)),
        grid=grid,
        in_specs=[pl.BlockSpec((TB, H), lambda i: (i, 0)),
                  pl.BlockSpec((1, H), lambda i: (0, 0)),
                  pl.BlockSpec((H, L), lambda i: (0, 0)),
                  pl.BlockSpec((H, L), lambda i: (0, 0)),
                  pl.BlockSpec((1, L), lambda i: (0, 0))],
        out_specs=(pl.BlockSpec((TB, L), lambda i: (i, 0)),
                   pl.BlockSpec((TB, L), lambda i: (i, 0))),
        compiler_params=pltpu.CompilerParams(dimension_semantics=("parallel",)),
    )(fact, sec_hidden, w_match_fact_T, w_match_sec_T, b_match)
    return logits, scores


def init_params(key, hidden_size, num_labels):
    H = hidden_size
    H2 = H // 2
    ks = jax.random.split(key, 14)

    def u(k, shape, lim):
        return jax.random.uniform(k, shape, jnp.float32, -lim, lim)

    lstm_lim = float(1.0 / (H2 ** 0.5))
    lin_lim_attn = float(1.0 / (H ** 0.5))
    lin_lim_match = float(1.0 / ((2 * H) ** 0.5))

    params = {
        # forward-direction LSTM (bias_ih + bias_hh folded into one bias)
        'w_ih_f': u(ks[0], (4 * H2, H), lstm_lim),
        'w_hh_f': u(ks[1], (4 * H2, H2), lstm_lim),
        'b_f':   u(ks[2], (1, 4 * H2), lstm_lim) + u(ks[3], (1, 4 * H2), lstm_lim),
        # backward-direction LSTM
        'w_ih_b': u(ks[4], (4 * H2, H), lstm_lim),
        'w_hh_b': u(ks[5], (4 * H2, H2), lstm_lim),
        'b_b':   u(ks[6], (1, 4 * H2), lstm_lim) + u(ks[7], (1, 4 * H2), lstm_lim),
        # attn_fc: Linear(H, H)
        'w_attn': u(ks[8], (H, H), lin_lim_attn),
        'b_attn': u(ks[9], (1, H), lin_lim_attn),
        # context parameter: torch.rand(H) in [0, 1)
        'ctx': jax.random.uniform(ks[10], (1, H), jnp.float32, 0.0, 1.0),
        # match_fc: Linear(2H, num_labels)
        'w_match': u(ks[11], (num_labels, 2 * H), lin_lim_match),
        'b_match': u(ks[12], (1, num_labels), lin_lim_match),
    }
    return params


if __name__ == "__main__":
    B, S, H, L = 2, 8, 32, 4   # batch, num sections (seq), hidden_size, num_labels
    key = jax.random.PRNGKey(0)
    k_fact, k_sec, k_par = jax.random.split(key, 3)

    fact_inputs = jax.random.normal(k_fact, (B, H), jnp.float32)
    sec_inputs = jax.random.normal(k_sec, (S, H), jnp.float32)
    params = init_params(k_par, H, L)

    logits, scores = matchnet_forward(fact_inputs, sec_inputs, params)
    jax.block_until_ready((logits, scores))

    assert logits.shape == (B, L) and scores.shape == (B, L)
    assert bool(jnp.all(jnp.isfinite(logits))) and bool(jnp.all((scores >= 0) & (scores <= 1)))
    print("KERNEL_OK")
</pallas_src>

<mosaic_0001>
module attributes {stable_mosaic.version = 11 : i64} {
  func.func @lstm_attn_kernel(%arg0: memref<8x32xf32, #tpu.memory_space<vmem>>, %arg1: memref<32x128xbf16, #tpu.memory_space<vmem>>, %arg2: memref<1x128xf32, #tpu.memory_space<vmem>>, %arg3: memref<16x64xf32, #tpu.memory_space<vmem>>, %arg4: memref<16x64xf32, #tpu.memory_space<vmem>>, %arg5: memref<32x32xbf16, #tpu.memory_space<vmem>>, %arg6: memref<1x32xf32, #tpu.memory_space<vmem>>, %arg7: memref<1x32xf32, #tpu.memory_space<vmem>>, %arg8: memref<1x32xf32, #tpu.memory_space<vmem>>, %arg9: memref<8x64xf32, #tpu.memory_space<vmem>>, %arg10: memref<8x64xf32, #tpu.memory_space<vmem>>, %arg11: memref<8x32xf32, #tpu.memory_space<vmem>>) attributes {dimension_semantics = [], scalar_prefetch = 0 : i64, scratch_operands = 3 : i64, tpu.core_type = #tpu.core_type<tc>} {
    %c0 = arith.constant 0 : index
    %c0_0 = arith.constant 0 : index
    %0 = vector.load %arg0[%c0, %c0_0] : memref<8x32xf32, #tpu.memory_space<vmem>>, vector<8x32xf32>
    %1 = arith.truncf %0 : vector<8x32xf32> to vector<8x32xbf16>
    %c0_1 = arith.constant 0 : index
    %c0_2 = arith.constant 0 : index
    %2 = vector.load %arg1[%c0_1, %c0_2] : memref<32x128xbf16, #tpu.memory_space<vmem>>, vector<32x128xbf16>
    %cst = arith.constant dense<0.000000e+00> : vector<8x128xf32>
    %3 = tpu.matmul %1, %2, %cst {dimension_numbers = #tpu.dot_dimension_numbers<[1], [0], [0], [1], [0, 0, 1, 1], [], []>} : vector<8x32xbf16>, vector<32x128xbf16>, vector<8x128xf32> -> vector<8x128xf32>
    %c0_3 = arith.constant 0 : index
    %c0_4 = arith.constant 0 : index
    %4 = vector.load %arg2[%c0_3, %c0_4] : memref<1x128xf32, #tpu.memory_space<vmem>>, vector<1x128xf32>
    %5 = vector.broadcast %4 : vector<1x128xf32> to vector<8x128xf32>
    %6 = arith.addf %3, %5 : vector<8x128xf32>
    %7 = vector.extract_strided_slice %6 {offsets = [0, 0], sizes = [8, 64], strides = [1, 1]} : vector<8x128xf32> to vector<8x64xf32>
    %c0_5 = arith.constant 0 : index
    %c0_6 = arith.constant 0 : index
    %8 = vector.load %arg9[%c0_5, %c0_6] : memref<8x64xf32, #tpu.memory_space<vmem>>, vector<8x64xf32>
    tpu.vector_store %arg9[%c0_5, %c0_6], %7 {strides = array<i32>} : memref<8x64xf32, #tpu.memory_space<vmem>>, vector<8x64xf32>,
    %9 = vector.extract_strided_slice %6 {offsets = [0, 64], sizes = [8, 64], strides = [1, 1]} : vector<8x128xf32> to vector<8x64xf32>
    %c0_7 = arith.constant 0 : index
    %c0_8 = arith.constant 0 : index
    %10 = vector.load %arg10[%c0_7, %c0_8] : memref<8x64xf32, #tpu.memory_space<vmem>>, vector<8x64xf32>
    tpu.vector_store %arg10[%c0_7, %c0_8], %9 {strides = array<i32>} : memref<8x64xf32, #tpu.memory_space<vmem>>, vector<8x64xf32>,
    %c0_9 = arith.constant 0 : index
    %c0_10 = arith.constant 0 : index
    %11 = vector.load %arg3[%c0_9, %c0_10] : memref<16x64xf32, #tpu.memory_space<vmem>>, vector<16x64xf32>
    %c0_11 = arith.constant 0 : index
    %c0_12 = arith.constant 0 : index
    %12 = vector.load %arg4[%c0_11, %c0_12] : memref<16x64xf32, #tpu.memory_space<vmem>>, vector<16x64xf32>
    %cst_13 = arith.constant 0.000000e+00 : f32
    %13 = vector.broadcast %cst_13 : f32 to vector<1x16xf32>
    %c0_i32 = arith.constant 0 : i32
    %c7_i32 = arith.constant 7 : i32
    %14 = arith.subi %c7_i32, %c0_i32 : i32
    %15 = arith.index_cast %c0_i32 : i32 to index
    %c0_14 = arith.constant 0 : index
    %16 = vector.load %arg9[%15, %c0_14] : memref<8x64xf32, #tpu.memory_space<vmem>>, vector<1x64xf32>
    %cst_15 = arith.constant dense<0.000000e+00> : vector<1x64xf32>
    %17 = tpu.matmul %13, %11, %cst_15 {dimension_numbers = #tpu.dot_dimension_numbers<[1], [0], [0], [1], [0, 0, 1, 1], [], []>} : vector<1x16xf32>, vector<16x64xf32>, vector<1x64xf32> -> vector<1x64xf32>
    %18 = arith.addf %16, %17 : vector<1x64xf32>
    %19 = vector.extract_strided_slice %18 {offsets = [0, 0], sizes = [1, 16], strides = [1, 1]} : vector<1x64xf32> to vector<1x16xf32>
    %20 = arith.negf %19 : vector<1x16xf32>
    %21 = math.exp %20 : vector<1x16xf32>
    %cst_16 = arith.constant 1.000000e+00 : f32
    %22 = vector.broadcast %cst_16 : f32 to vector<1x16xf32>
    %23 = arith.addf %22, %21 : vector<1x16xf32>
    %24 = arith.divf %22, %23 : vector<1x16xf32>
    %25 = vector.extract_strided_slice %18 {offsets = [0, 16], sizes = [1, 16], strides = [1, 1]} : vector<1x64xf32> to vector<1x16xf32>
    %26 = arith.negf %25 : vector<1x16xf32>
    %27 = math.exp %26 : vector<1x16xf32>
    %cst_17 = arith.constant 1.000000e+00 : f32
    %28 = vector.broadcast %cst_17 : f32 to vector<1x16xf32>
    %29 = arith.addf %28, %27 : vector<1x16xf32>
    %30 = arith.divf %28, %29 : vector<1x16xf32>
    %31 = vector.extract_strided_slice %18 {offsets = [0, 32], sizes = [1, 16], strides = [1, 1]} : vector<1x64xf32> to vector<1x16xf32>
    %32 = math.tanh %31 : vector<1x16xf32>
    %33 = vector.extract_strided_slice %18 {offsets = [0, 48], sizes = [1, 16], strides = [1, 1]} : vector<1x64xf32> to vector<1x16xf32>
    %34 = arith.negf %33 : vector<1x16xf32>
    %35 = math.exp %34 : vector<1x16xf32>
    %cst_18 = arith.constant 1.000000e+00 : f32
    %36 = vector.broadcast %cst_18 : f32 to vector<1x16xf32>
    %37 = arith.addf %36, %35 : vector<1x16xf32>
    %38 = arith.divf %36, %37 : vector<1x16xf32>
    %39 = arith.mulf %30, %13 : vector<1x16xf32>
    %40 = arith.mulf %24, %32 : vector<1x16xf32>
    %41 = arith.addf %39, %40 : vector<1x16xf32>
    %42 = math.tanh %41 : vector<1x16xf32>
    %43 = arith.mulf %38, %42 : vector<1x16xf32>
    %44 = arith.index_cast %c0_i32 : i32 to index
    %c0_19 = arith.constant 0 : index
    %45 = vector.load %arg11[%44, %c0_19] : memref<8x32xf32, #tpu.memory_space<vmem>>, vector<1x16xf32>
    tpu.vector_store %arg11[%44, %c0_19], %43 {strides = array<i32>} : memref<8x32xf32, #tpu.memory_space<vmem>>, vector<1x16xf32>,
    %46 = arith.index_cast %14 : i32 to index
    %c0_20 = arith.constant 0 : index
    %47 = vector.load %arg10[%46, %c0_20] : memref<8x64xf32, #tpu.memory_space<vmem>>, vector<1x64xf32>
    %cst_21 = arith.constant dense<0.000000e+00> : vector<1x64xf32>
    %48 = tpu.matmul %13, %12, %cst_21 {dimension_numbers = #tpu.dot_dimension_numbers<[1], [0], [0], [1], [0, 0, 1, 1], [], []>} : vector<1x16xf32>, vector<16x64xf32>, vector<1x64xf32> -> vector<1x64xf32>
    %49 = arith.addf %47, %48 : vector<1x64xf32>
    %50 = vector.extract_strided_slice %49 {offsets = [0, 0], sizes = [1, 16], strides = [1, 1]} : vector<1x64xf32> to vector<1x16xf32>
    %51 = arith.negf %50 : vector<1x16xf32>
    %52 = math.exp %51 : vector<1x16xf32>
    %cst_22 = arith.constant 1.000000e+00 : f32
    %53 = vector.broadcast %cst_22 : f32 to vector<1x16xf32>
    %54 = arith.addf %53, %52 : vector<1x16xf32>
    %55 = arith.divf %53, %54 : vector<1x16xf32>
    %56 = vector.extract_strided_slice %49 {offsets = [0, 16], sizes = [1, 16], strides = [1, 1]} : vector<1x64xf32> to vector<1x16xf32>
    %57 = arith.negf %56 : vector<1x16xf32>
    %58 = math.exp %57 : vector<1x16xf32>
    %cst_23 = arith.constant 1.000000e+00 : f32
    %59 = vector.broadcast %cst_23 : f32 to vector<1x16xf32>
    %60 = arith.addf %59, %58 : vector<1x16xf32>
    %61 = arith.divf %59, %60 : vector<1x16xf32>
    %62 = vector.extract_strided_slice %49 {offsets = [0, 32], sizes = [1, 16], strides = [1, 1]} : vector<1x64xf32> to vector<1x16xf32>
    %63 = math.tanh %62 : vector<1x16xf32>
    %64 = vector.extract_strided_slice %49 {offsets = [0, 48], sizes = [1, 16], strides = [1, 1]} : vector<1x64xf32> to vector<1x16xf32>
    %65 = arith.negf %64 : vector<1x16xf32>
    %66 = math.exp %65 : vector<1x16xf32>
    %cst_24 = arith.constant 1.000000e+00 : f32
    %67 = vector.broadcast %cst_24 : f32 to vector<1x16xf32>
    %68 = arith.addf %67, %66 : vector<1x16xf32>
    %69 = arith.divf %67, %68 : vector<1x16xf32>
    %70 = arith.mulf %61, %13 : vector<1x16xf32>
    %71 = arith.mulf %55, %63 : vector<1x16xf32>
    %72 = arith.addf %70, %71 : vector<1x16xf32>
    %73 = math.tanh %72 : vector<1x16xf32>
    %74 = arith.mulf %69, %73 : vector<1x16xf32>
    %75 = arith.index_cast %14 : i32 to index
    %c16 = arith.constant 16 : index
    %76 = vector.load %arg11[%75, %c16] : memref<8x32xf32, #tpu.memory_space<vmem>>, vector<1x16xf32>
    tpu.vector_store %arg11[%75, %c16], %74 {strides = array<i32>} : memref<8x32xf32, #tpu.memory_space<vmem>>, vector<1x16xf32>,
    %c1_i32 = arith.constant 1 : i32
    %c7_i32_25 = arith.constant 7 : i32
    %77 = arith.subi %c7_i32_25, %c1_i32 : i32
    %78 = arith.index_cast %c1_i32 : i32 to index
    %c0_26 = arith.constant 0 : index
    %79 = vector.load %arg9[%78, %c0_26] : memref<8x64xf32, #tpu.memory_space<vmem>>, vector<1x64xf32>
    %cst_27 = arith.constant dense<0.000000e+00> : vector<1x64xf32>
    %80 = tpu.matmul %43, %11, %cst_27 {dimension_numbers = #tpu.dot_dimension_numbers<[1], [0], [0], [1], [0, 0, 1, 1], [], []>} : vector<1x16xf32>, vector<16x64xf32>, vector<1x64xf32> -> vector<1x64xf32>
    %81 = arith.addf %79, %80 : vector<1x64xf32>
    %82 = vector.extract_strided_slice %81 {offsets = [0, 0], sizes = [1, 16], strides = [1, 1]} : vector<1x64xf32> to vector<1x16xf32>
    %83 = arith.negf %82 : vector<1x16xf32>
    %84 = math.exp %83 : vector<1x16xf32>
    %cst_28 = arith.constant 1.000000e+00 : f32
    %85 = vector.broadcast %cst_28 : f32 to vector<1x16xf32>
    %86 = arith.addf %85, %84 : vector<1x16xf32>
    %87 = arith.divf %85, %86 : vector<1x16xf32>
    %88 = vector.extract_strided_slice %81 {offsets = [0, 16], sizes = [1, 16], strides = [1, 1]} : vector<1x64xf32> to vector<1x16xf32>
    %89 = arith.negf %88 : vector<1x16xf32>
    %90 = math.exp %89 : vector<1x16xf32>
    %cst_29 = arith.constant 1.000000e+00 : f32
    %91 = vector.broadcast %cst_29 : f32 to vector<1x16xf32>
    %92 = arith.addf %91, %90 : vector<1x16xf32>
    %93 = arith.divf %91, %92 : vector<1x16xf32>
    %94 = vector.extract_strided_slice %81 {offsets = [0, 32], sizes = [1, 16], strides = [1, 1]} : vector<1x64xf32> to vector<1x16xf32>
    %95 = math.tanh %94 : vector<1x16xf32>
    %96 = vector.extract_strided_slice %81 {offsets = [0, 48], sizes = [1, 16], strides = [1, 1]} : vector<1x64xf32> to vector<1x16xf32>
    %97 = arith.negf %96 : vector<1x16xf32>
    %98 = math.exp %97 : vector<1x16xf32>
    %cst_30 = arith.constant 1.000000e+00 : f32
    %99 = vector.broadcast %cst_30 : f32 to vector<1x16xf32>
    %100 = arith.addf %99, %98 : vector<1x16xf32>
    %101 = arith.divf %99, %100 : vector<1x16xf32>
    %102 = arith.mulf %93, %41 : vector<1x16xf32>
    %103 = arith.mulf %87, %95 : vector<1x16xf32>
    %104 = arith.addf %102, %103 : vector<1x16xf32>
    %105 = math.tanh %104 : vector<1x16xf32>
    %106 = arith.mulf %101, %105 : vector<1x16xf32>
    %107 = arith.index_cast %c1_i32 : i32 to index
    %c0_31 = arith.constant 0 : index
    %108 = vector.load %arg11[%107, %c0_31] : memref<8x32xf32, #tpu.memory_space<vmem>>, vector<1x16xf32>
    tpu.vector_store %arg11[%107, %c0_31], %106 {strides = array<i32>} : memref<8x32xf32, #tpu.memory_space<vmem>>, vector<1x16xf32>,
    %109 = arith.index_cast %77 : i32 to index
    %c0_32 = arith.constant 0 : index
    %110 = vector.load %arg10[%109, %c0_32] : memref<8x64xf32, #tpu.memory_space<vmem>>, vector<1x64xf32>
    %cst_33 = arith.constant dense<0.000000e+00> : vector<1x64xf32>
    %111 = tpu.matmul %74, %12, %cst_33 {dimension_numbers = #tpu.dot_dimension_numbers<[1], [0], [0], [1], [0, 0, 1, 1], [], []>} : vector<1x16xf32>, vector<16x64xf32>, vector<1x64xf32> -> vector<1x64xf32>
    %112 = arith.addf %110, %111 : vector<1x64xf32>
    %113 = vector.extract_strided_slice %112 {offsets = [0, 0], sizes = [1, 16], strides = [1, 1]} : vector<1x64xf32> to vector<1x16xf32>
    %114 = arith.negf %113 : vector<1x16xf32>
    %115 = math.exp %114 : vector<1x16xf32>
    %cst_34 = arith.constant 1.000000e+00 : f32
    %116 = vector.broadcast %cst_34 : f32 to vector<1x16xf32>
    %117 = arith.addf %116, %115 : vector<1x16xf32>
    %118 = arith.divf %116, %117 : vector<1x16xf32>
    %119 = vector.extract_strided_slice %112 {offsets = [0, 16], sizes = [1, 16], strides = [1, 1]} : vector<1x64xf32> to vector<1x16xf32>
    %120 = arith.negf %119 : vector<1x16xf32>
    %121 = math.exp %120 : vector<1x16xf32>
    %cst_35 = arith.constant 1.000000e+00 : f32
    %122 = vector.broadcast %cst_35 : f32 to vector<1x16xf32>
    %123 = arith.addf %122, %121 : vector<1x16xf32>
    %124 = arith.divf %122, %123 : vector<1x16xf32>
    %125 = vector.extract_strided_slice %112 {offsets = [0, 32], sizes = [1, 16], strides = [1, 1]} : vector<1x64xf32> to vector<1x16xf32>
    %126 = math.tanh %125 : vector<1x16xf32>
    %127 = vector.extract_strided_slice %112 {offsets = [0, 48], sizes = [1, 16], strides = [1, 1]} : vector<1x64xf32> to vector<1x16xf32>
    %128 = arith.negf %127 : vector<1x16xf32>
    %129 = math.exp %128 : vector<1x16xf32>
    %cst_36 = arith.constant 1.000000e+00 : f32
    %130 = vector.broadcast %cst_36 : f32 to vector<1x16xf32>
    %131 = arith.addf %130, %129 : vector<1x16xf32>
    %132 = arith.divf %130, %131 : vector<1x16xf32>
    %133 = arith.mulf %124, %72 : vector<1x16xf32>
    %134 = arith.mulf %118, %126 : vector<1x16xf32>
    %135 = arith.addf %133, %134 : vector<1x16xf32>
    %136 = math.tanh %135 : vector<1x16xf32>
    %137 = arith.mulf %132, %136 : vector<1x16xf32>
    %138 = arith.index_cast %77 : i32 to index
    %c16_37 = arith.constant 16 : index
    %139 = vector.load %arg11[%138, %c16_37] : memref<8x32xf32, #tpu.memory_space<vmem>>, vector<1x16xf32>
    tpu.vector_store %arg11[%138, %c16_37], %137 {strides = array<i32>} : memref<8x32xf32, #tpu.memory_space<vmem>>, vector<1x16xf32>,
    %c2_i32 = arith.constant 2 : i32
    %c7_i32_38 = arith.constant 7 : i32
    %140 = arith.subi %c7_i32_38, %c2_i32 : i32
    %141 = arith.index_cast %c2_i32 : i32 to index
    %c0_39 = arith.constant 0 : index
    %142 = vector.load %arg9[%141, %c0_39] : memref<8x64xf32, #tpu.memory_space<vmem>>, vector<1x64xf32>
    %cst_40 = arith.constant dense<0.000000e+00> : vector<1x64xf32>
    %143 = tpu.matmul %106, %11, %cst_40 {dimension_numbers = #tpu.dot_dimension_numbers<[1], [0], [0], [1], [0, 0, 1, 1], [], []>} : vector<1x16xf32>, vector<16x64xf32>, vector<1x64xf32> -> vector<1x64xf32>
    %144 = arith.addf %142, %143 : vector<1x64xf32>
    %145 = vector.extract_strided_slice %144 {offsets = [0, 0], sizes = [1, 16], strides = [1, 1]} : vector<1x64xf32> to vector<1x16xf32>
    %146 = arith.negf %145 : vector<1x16xf32>
    %147 = math.exp %146 : vector<1x16xf32>
    %cst_41 = arith.constant 1.000000e+00 : f32
    %148 = vector.broadcast %cst_41 : f32 to vector<1x16xf32>
    %149 = arith.addf %148, %147 : vector<1x16xf32>
    %150 = arith.divf %148, %149 : vector<1x16xf32>
    %151 = vector.extract_strided_slice %144 {offsets = [0, 16], sizes = [1, 16], strides = [1, 1]} : vector<1x64xf32> to vector<1x16xf32>
    %152 = arith.negf %151 : vector<1x16xf32>
    %153 = math.exp %152 : vector<1x16xf32>
    %cst_42 = arith.constant 1.000000e+00 : f32
    %154 = vector.broadcast %cst_42 : f32 to vector<1x16xf32>
    %155 = arith.addf %154, %153 : vector<1x16xf32>
    %156 = arith.divf %154, %155 : vector<1x16xf32>
    %157 = vector.extract_strided_slice %144 {offsets = [0, 32], sizes = [1, 16], strides = [1, 1]} : vector<1x64xf32> to vector<1x16xf32>
    %158 = math.tanh %157 : vector<1x16xf32>
    %159 = vector.extract_strided_slice %144 {offsets = [0, 48], sizes = [1, 16], strides = [1, 1]} : vector<1x64xf32> to vector<1x16xf32>
    %160 = arith.negf %159 : vector<1x16xf32>
    %161 = math.exp %160 : vector<1x16xf32>
    %cst_43 = arith.constant 1.000000e+00 : f32
    %162 = vector.broadcast %cst_43 : f32 to vector<1x16xf32>
    %163 = arith.addf %162, %161 : vector<1x16xf32>
    %164 = arith.divf %162, %163 : vector<1x16xf32>
    %165 = arith.mulf %156, %104 : vector<1x16xf32>
    %166 = arith.mulf %150, %158 : vector<1x16xf32>
    %167 = arith.addf %165, %166 : vector<1x16xf32>
    %168 = math.tanh %167 : vector<1x16xf32>
    %169 = arith.mulf %164, %168 : vector<1x16xf32>
    %170 = arith.index_cast %c2_i32 : i32 to index
    %c0_44 = arith.constant 0 : index
    %171 = vector.load %arg11[%170, %c0_44] : memref<8x32xf32, #tpu.memory_space<vmem>>, vector<1x16xf32>
    tpu.vector_store %arg11[%170, %c0_44], %169 {strides = array<i32>} : memref<8x32xf32, #tpu.memory_space<vmem>>, vector<1x16xf32>,
    %172 = arith.index_cast %140 : i32 to index
    %c0_45 = arith.constant 0 : index
    %173 = vector.load %arg10[%172, %c0_45] : memref<8x64xf32, #tpu.memory_space<vmem>>, vector<1x64xf32>
    %cst_46 = arith.constant dense<0.000000e+00> : vector<1x64xf32>
    %174 = tpu.matmul %137, %12, %cst_46 {dimension_numbers = #tpu.dot_dimension_numbers<[1], [0], [0], [1], [0, 0, 1, 1], [], []>} : vector<1x16xf32>, vector<16x64xf32>, vector<1x64xf32> -> vector<1x64xf32>
    %175 = arith.addf %173, %174 : vector<1x64xf32>
    %176 = vector.extract_strided_slice %175 {offsets = [0, 0], sizes = [1, 16], strides = [1, 1]} : vector<1x64xf32> to vector<1x16xf32>
    %177 = arith.negf %176 : vector<1x16xf32>
    %178 = math.exp %177 : vector<1x16xf32>
    %cst_47 = arith.constant 1.000000e+00 : f32
    %179 = vector.broadcast %cst_47 : f32 to vector<1x16xf32>
    %180 = arith.addf %179, %178 : vector<1x16xf32>
    %181 = arith.divf %179, %180 : vector<1x16xf32>
    %182 = vector.extract_strided_slice %175 {offsets = [0, 16], sizes = [1, 16], strides = [1, 1]} : vector<1x64xf32> to vector<1x16xf32>
    %183 = arith.negf %182 : vector<1x16xf32>
    %184 = math.exp %183 : vector<1x16xf32>
    %cst_48 = arith.constant 1.000000e+00 : f32
    %185 = vector.broadcast %cst_48 : f32 to vector<1x16xf32>
    %186 = arith.addf %185, %184 : vector<1x16xf32>
    %187 = arith.divf %185, %186 : vector<1x16xf32>
    %188 = vector.extract_strided_slice %175 {offsets = [0, 32], sizes = [1, 16], strides = [1, 1]} : vector<1x64xf32> to vector<1x16xf32>
    %189 = math.tanh %188 : vector<1x16xf32>
    %190 = vector.extract_strided_slice %175 {offsets = [0, 48], sizes = [1, 16], strides = [1, 1]} : vector<1x64xf32> to vector<1x16xf32>
    %191 = arith.negf %190 : vector<1x16xf32>
    %192 = math.exp %191 : vector<1x16xf32>
    %cst_49 = arith.constant 1.000000e+00 : f32
    %193 = vector.broadcast %cst_49 : f32 to vector<1x16xf32>
    %194 = arith.addf %193, %192 : vector<1x16xf32>
    %195 = arith.divf %193, %194 : vector<1x16xf32>
    %196 = arith.mulf %187, %135 : vector<1x16xf32>
    %197 = arith.mulf %181, %189 : vector<1x16xf32>
    %198 = arith.addf %196, %197 : vector<1x16xf32>
    %199 = math.tanh %198 : vector<1x16xf32>
    %200 = arith.mulf %195, %199 : vector<1x16xf32>
    %201 = arith.index_cast %140 : i32 to index
    %c16_50 = arith.constant 16 : index
    %202 = vector.load %arg11[%201, %c16_50] : memref<8x32xf32, #tpu.memory_space<vmem>>, vector<1x16xf32>
    tpu.vector_store %arg11[%201, %c16_50], %200 {strides = array<i32>} : memref<8x32xf32, #tpu.memory_space<vmem>>, vector<1x16xf32>,
    %c3_i32 = arith.constant 3 : i32
    %c7_i32_51 = arith.constant 7 : i32
    %203 = arith.subi %c7_i32_51, %c3_i32 : i32
    %204 = arith.index_cast %c3_i32 : i32 to index
    %c0_52 = arith.constant 0 : index
    %205 = vector.load %arg9[%204, %c0_52] : memref<8x64xf32, #tpu.memory_space<vmem>>, vector<1x64xf32>
    %cst_53 = arith.constant dense<0.000000e+00> : vector<1x64xf32>
    %206 = tpu.matmul %169, %11, %cst_53 {dimension_numbers = #tpu.dot_dimension_numbers<[1], [0], [0], [1], [0, 0, 1, 1], [], []>} : vector<1x16xf32>, vector<16x64xf32>, vector<1x64xf32> -> vector<1x64xf32>
    %207 = arith.addf %205, %206 : vector<1x64xf32>
    %208 = vector.extract_strided_slice %207 {offsets = [0, 0], sizes = [1, 16], strides = [1, 1]} : vector<1x64xf32> to vector<1x16xf32>
    %209 = arith.negf %208 : vector<1x16xf32>
    %210 = math.exp %209 : vector<1x16xf32>
    %cst_54 = arith.constant 1.000000e+00 : f32
    %211 = vector.broadcast %cst_54 : f32 to vector<1x16xf32>
    %212 = arith.addf %211, %210 : vector<1x16xf32>
    %213 = arith.divf %211, %212 : vector<1x16xf32>
    %214 = vector.extract_strided_slice %207 {offsets = [0, 16], sizes = [1, 16], strides = [1, 1]} : vector<1x64xf32> to vector<1x16xf32>
    %215 = arith.negf %214 : vector<1x16xf32>
    %216 = math.exp %215 : vector<1x16xf32>
    %cst_55 = arith.constant 1.000000e+00 : f32
    %217 = vector.broadcast %cst_55 : f32 to vector<1x16xf32>
    %218 = arith.addf %217, %216 : vector<1x16xf32>
    %219 = arith.divf %217, %218 : vector<1x16xf32>
    %220 = vector.extract_strided_slice %207 {offsets = [0, 32], sizes = [1, 16], strides = [1, 1]} : vector<1x64xf32> to vector<1x16xf32>
    %221 = math.tanh %220 : vector<1x16xf32>
    %222 = vector.extract_strided_slice %207 {offsets = [0, 48], sizes = [1, 16], strides = [1, 1]} : vector<1x64xf32> to vector<1x16xf32>
    %223 = arith.negf %222 : vector<1x16xf32>
    %224 = math.exp %223 : vector<1x16xf32>
    %cst_56 = arith.constant 1.000000e+00 : f32
    %225 = vector.broadcast %cst_56 : f32 to vector<1x16xf32>
    %226 = arith.addf %225, %224 : vector<1x16xf32>
    %227 = arith.divf %225, %226 : vector<1x16xf32>
    %228 = arith.mulf %219, %167 : vector<1x16xf32>
    %229 = arith.mulf %213, %221 : vector<1x16xf32>
    %230 = arith.addf %228, %229 : vector<1x16xf32>
    %231 = math.tanh %230 : vector<1x16xf32>
    %232 = arith.mulf %227, %231 : vector<1x16xf32>
    %233 = arith.index_cast %c3_i32 : i32 to index
    %c0_57 = arith.constant 0 : index
    %234 = vector.load %arg11[%233, %c0_57] : memref<8x32xf32, #tpu.memory_space<vmem>>, vector<1x16xf32>
    tpu.vector_store %arg11[%233, %c0_57], %232 {strides = array<i32>} : memref<8x32xf32, #tpu.memory_space<vmem>>, vector<1x16xf32>,
    %235 = arith.index_cast %203 : i32 to index
    %c0_58 = arith.constant 0 : index
    %236 = vector.load %arg10[%235, %c0_58] : memref<8x64xf32, #tpu.memory_space<vmem>>, vector<1x64xf32>
    %cst_59 = arith.constant dense<0.000000e+00> : vector<1x64xf32>
    %237 = tpu.matmul %200, %12, %cst_59 {dimension_numbers = #tpu.dot_dimension_numbers<[1], [0], [0], [1], [0, 0, 1, 1], [], []>} : vector<1x16xf32>, vector<16x64xf32>, vector<1x64xf32> -> vector<1x64xf32>
    %238 = arith.addf %236, %237 : vector<1x64xf32>
    %239 = vector.extract_strided_slice %238 {offsets = [0, 0], sizes = [1, 16], strides = [1, 1]} : vector<1x64xf32> to vector<1x16xf32>
    %240 = arith.negf %239 : vector<1x16xf32>
    %241 = math.exp %240 : vector<1x16xf32>
    %cst_60 = arith.constant 1.000000e+00 : f32
    %242 = vector.broadcast %cst_60 : f32 to vector<1x16xf32>
    %243 = arith.addf %242, %241 : vector<1x16xf32>
    %244 = arith.divf %242, %243 : vector<1x16xf32>
    %245 = vector.extract_strided_slice %238 {offsets = [0, 16], sizes = [1, 16], strides = [1, 1]} : vector<1x64xf32> to vector<1x16xf32>
    %246 = arith.negf %245 : vector<1x16xf32>
    %247 = math.exp %246 : vector<1x16xf32>
    %cst_61 = arith.constant 1.000000e+00 : f32
    %248 = vector.broadcast %cst_61 : f32 to vector<1x16xf32>
    %249 = arith.addf %248, %247 : vector<1x16xf32>
    %250 = arith.divf %248, %249 : vector<1x16xf32>
    %251 = vector.extract_strided_slice %238 {offsets = [0, 32], sizes = [1, 16], strides = [1, 1]} : vector<1x64xf32> to vector<1x16xf32>
    %252 = math.tanh %251 : vector<1x16xf32>
    %253 = vector.extract_strided_slice %238 {offsets = [0, 48], sizes = [1, 16], strides = [1, 1]} : vector<1x64xf32> to vector<1x16xf32>
    %254 = arith.negf %253 : vector<1x16xf32>
    %255 = math.exp %254 : vector<1x16xf32>
    %cst_62 = arith.constant 1.000000e+00 : f32
    %256 = vector.broadcast %cst_62 : f32 to vector<1x16xf32>
    %257 = arith.addf %256, %255 : vector<1x16xf32>
    %258 = arith.divf %256, %257 : vector<1x16xf32>
    %259 = arith.mulf %250, %198 : vector<1x16xf32>
    %260 = arith.mulf %244, %252 : vector<1x16xf32>
    %261 = arith.addf %259, %260 : vector<1x16xf32>
    %262 = math.tanh %261 : vector<1x16xf32>
    %263 = arith.mulf %258, %262 : vector<1x16xf32>
    %264 = arith.index_cast %203 : i32 to index
    %c16_63 = arith.constant 16 : index
    %265 = vector.load %arg11[%264, %c16_63] : memref<8x32xf32, #tpu.memory_space<vmem>>, vector<1x16xf32>
    tpu.vector_store %arg11[%264, %c16_63], %263 {strides = array<i32>} : memref<8x32xf32, #tpu.memory_space<vmem>>, vector<1x16xf32>,
    %c4_i32 = arith.constant 4 : i32
    %c7_i32_64 = arith.constant 7 : i32
    %266 = arith.subi %c7_i32_64, %c4_i32 : i32
    %267 = arith.index_cast %c4_i32 : i32 to index
    %c0_65 = arith.constant 0 : index
    %268 = vector.load %arg9[%267, %c0_65] : memref<8x64xf32, #tpu.memory_space<vmem>>, vector<1x64xf32>
    %cst_66 = arith.constant dense<0.000000e+00> : vector<1x64xf32>
    %269 = tpu.matmul %232, %11, %cst_66 {dimension_numbers = #tpu.dot_dimension_numbers<[1], [0], [0], [1], [0, 0, 1, 1], [], []>} : vector<1x16xf32>, vector<16x64xf32>, vector<1x64xf32> -> vector<1x64xf32>
    %270 = arith.addf %268, %269 : vector<1x64xf32>
    %271 = vector.extract_strided_slice %270 {offsets = [0, 0], sizes = [1, 16], strides = [1, 1]} : vector<1x64xf32> to vector<1x16xf32>
    %272 = arith.negf %271 : vector<1x16xf32>
    %273 = math.exp %272 : vector<1x16xf32>
    %cst_67 = arith.constant 1.000000e+00 : f32
    %274 = vector.broadcast %cst_67 : f32 to vector<1x16xf32>
    %275 = arith.addf %274, %273 : vector<1x16xf32>
    %276 = arith.divf %274, %275 : vector<1x16xf32>
    %277 = vector.extract_strided_slice %270 {offsets = [0, 16], sizes = [1, 16], strides = [1, 1]} : vector<1x64xf32> to vector<1x16xf32>
    %278 = arith.negf %277 : vector<1x16xf32>
    %279 = math.exp %278 : vector<1x16xf32>
    %cst_68 = arith.constant 1.000000e+00 : f32
    %280 = vector.broadcast %cst_68 : f32 to vector<1x16xf32>
    %281 = arith.addf %280, %279 : vector<1x16xf32>
    %282 = arith.divf %280, %281 : vector<1x16xf32>
    %283 = vector.extract_strided_slice %270 {offsets = [0, 32], sizes = [1, 16], strides = [1, 1]} : vector<1x64xf32> to vector<1x16xf32>
    %284 = math.tanh %283 : vector<1x16xf32>
    %285 = vector.extract_strided_slice %270 {offsets = [0, 48], sizes = [1, 16], strides = [1, 1]} : vector<1x64xf32> to vector<1x16xf32>
    %286 = arith.negf %285 : vector<1x16xf32>
    %287 = math.exp %286 : vector<1x16xf32>
    %cst_69 = arith.constant 1.000000e+00 : f32
    %288 = vector.broadcast %cst_69 : f32 to vector<1x16xf32>
    %289 = arith.addf %288, %287 : vector<1x16xf32>
    %290 = arith.divf %288, %289 : vector<1x16xf32>
    %291 = arith.mulf %282, %230 : vector<1x16xf32>
    %292 = arith.mulf %276, %284 : vector<1x16xf32>
    %293 = arith.addf %291, %292 : vector<1x16xf32>
    %294 = math.tanh %293 : vector<1x16xf32>
    %295 = arith.mulf %290, %294 : vector<1x16xf32>
    %296 = arith.index_cast %c4_i32 : i32 to index
    %c0_70 = arith.constant 0 : index
    %297 = vector.load %arg11[%296, %c0_70] : memref<8x32xf32, #tpu.memory_space<vmem>>, vector<1x16xf32>
    tpu.vector_store %arg11[%296, %c0_70], %295 {strides = array<i32>} : memref<8x32xf32, #tpu.memory_space<vmem>>, vector<1x16xf32>,
    %298 = arith.index_cast %266 : i32 to index
    %c0_71 = arith.constant 0 : index
    %299 = vector.load %arg10[%298, %c0_71] : memref<8x64xf32, #tpu.memory_space<vmem>>, vector<1x64xf32>
    %cst_72 = arith.constant dense<0.000000e+00> : vector<1x64xf32>
    %300 = tpu.matmul %263, %12, %cst_72 {dimension_numbers = #tpu.dot_dimension_numbers<[1], [0], [0], [1], [0, 0, 1, 1], [], []>} : vector<1x16xf32>, vector<16x64xf32>, vector<1x64xf32> -> vector<1x64xf32>
    %301 = arith.addf %299, %300 : vector<1x64xf32>
    %302 = vector.extract_strided_slice %301 {offsets = [0, 0], sizes = [1, 16], strides = [1, 1]} : vector<1x64xf32> to vector<1x16xf32>
    %303 = arith.negf %302 : vector<1x16xf32>
    %304 = math.exp %303 : vector<1x16xf32>
    %cst_73 = arith.constant 1.000000e+00 : f32
    %305 = vector.broadcast %cst_73 : f32 to vector<1x16xf32>
    %306 = arith.addf %305, %304 : vector<1x16xf32>
    %307 = arith.divf %305, %306 : vector<1x16xf32>
    %308 = vector.extract_strided_slice %301 {offsets = [0, 16], sizes = [1, 16], strides = [1, 1]} : vector<1x64xf32> to vector<1x16xf32>
    %309 = arith.negf %308 : vector<1x16xf32>
    %310 = math.exp %309 : vector<1x16xf32>
    %cst_74 = arith.constant 1.000000e+00 : f32
    %311 = vector.broadcast %cst_74 : f32 to vector<1x16xf32>
    %312 = arith.addf %311, %310 : vector<1x16xf32>
    %313 = arith.divf %311, %312 : vector<1x16xf32>
    %314 = vector.extract_strided_slice %301 {offsets = [0, 32], sizes = [1, 16], strides = [1, 1]} : vector<1x64xf32> to vector<1x16xf32>
    %315 = math.tanh %314 : vector<1x16xf32>
    %316 = vector.extract_strided_slice %301 {offsets = [0, 48], sizes = [1, 16], strides = [1, 1]} : vector<1x64xf32> to vector<1x16xf32>
    %317 = arith.negf %316 : vector<1x16xf32>
    %318 = math.exp %317 : vector<1x16xf32>
    %cst_75 = arith.constant 1.000000e+00 : f32
    %319 = vector.broadcast %cst_75 : f32 to vector<1x16xf32>
    %320 = arith.addf %319, %318 : vector<1x16xf32>
    %321 = arith.divf %319, %320 : vector<1x16xf32>
    %322 = arith.mulf %313, %261 : vector<1x16xf32>
    %323 = arith.mulf %307, %315 : vector<1x16xf32>
    %324 = arith.addf %322, %323 : vector<1x16xf32>
    %325 = math.tanh %324 : vector<1x16xf32>
    %326 = arith.mulf %321, %325 : vector<1x16xf32>
    %327 = arith.index_cast %266 : i32 to index
    %c16_76 = arith.constant 16 : index
    %328 = vector.load %arg11[%327, %c16_76] : memref<8x32xf32, #tpu.memory_space<vmem>>, vector<1x16xf32>
    tpu.vector_store %arg11[%327, %c16_76], %326 {strides = array<i32>} : memref<8x32xf32, #tpu.memory_space<vmem>>, vector<1x16xf32>,
    %c5_i32 = arith.constant 5 : i32
    %c7_i32_77 = arith.constant 7 : i32
    %329 = arith.subi %c7_i32_77, %c5_i32 : i32
    %330 = arith.index_cast %c5_i32 : i32 to index
    %c0_78 = arith.constant 0 : index
    %331 = vector.load %arg9[%330, %c0_78] : memref<8x64xf32, #tpu.memory_space<vmem>>, vector<1x64xf32>
    %cst_79 = arith.constant dense<0.000000e+00> : vector<1x64xf32>
    %332 = tpu.matmul %295, %11, %cst_79 {dimension_numbers = #tpu.dot_dimension_numbers<[1], [0], [0], [1], [0, 0, 1, 1], [], []>} : vector<1x16xf32>, vector<16x64xf32>, vector<1x64xf32> -> vector<1x64xf32>
    %333 = arith.addf %331, %332 : vector<1x64xf32>
    %334 = vector.extract_strided_slice %333 {offsets = [0, 0], sizes = [1, 16], strides = [1, 1]} : vector<1x64xf32> to vector<1x16xf32>
    %335 = arith.negf %334 : vector<1x16xf32>
    %336 = math.exp %335 : vector<1x16xf32>
    %cst_80 = arith.constant 1.000000e+00 : f32
    %337 = vector.broadcast %cst_80 : f32 to vector<1x16xf32>
    %338 = arith.addf %337, %336 : vector<1x16xf32>
    %339 = arith.divf %337, %338 : vector<1x16xf32>
    %340 = vector.extract_strided_slice %333 {offsets = [0, 16], sizes = [1, 16], strides = [1, 1]} : vector<1x64xf32> to vector<1x16xf32>
    %341 = arith.negf %340 : vector<1x16xf32>
    %342 = math.exp %341 : vector<1x16xf32>
    %cst_81 = arith.constant 1.000000e+00 : f32
    %343 = vector.broadcast %cst_81 : f32 to vector<1x16xf32>
    %344 = arith.addf %343, %342 : vector<1x16xf32>
    %345 = arith.divf %343, %344 : vector<1x16xf32>
    %346 = vector.extract_strided_slice %333 {offsets = [0, 32], sizes = [1, 16], strides = [1, 1]} : vector<1x64xf32> to vector<1x16xf32>
    %347 = math.tanh %346 : vector<1x16xf32>
    %348 = vector.extract_strided_slice %333 {offsets = [0, 48], sizes = [1, 16], strides = [1, 1]} : vector<1x64xf32> to vector<1x16xf32>
    %349 = arith.negf %348 : vector<1x16xf32>
    %350 = math.exp %349 : vector<1x16xf32>
    %cst_82 = arith.constant 1.000000e+00 : f32
    %351 = vector.broadcast %cst_82 : f32 to vector<1x16xf32>
    %352 = arith.addf %351, %350 : vector<1x16xf32>
    %353 = arith.divf %351, %352 : vector<1x16xf32>
    %354 = arith.mulf %345, %293 : vector<1x16xf32>
    %355 = arith.mulf %339, %347 : vector<1x16xf32>
    %356 = arith.addf %354, %355 : vector<1x16xf32>
    %357 = math.tanh %356 : vector<1x16xf32>
    %358 = arith.mulf %353, %357 : vector<1x16xf32>
    %359 = arith.index_cast %c5_i32 : i32 to index
    %c0_83 = arith.constant 0 : index
    %360 = vector.load %arg11[%359, %c0_83] : memref<8x32xf32, #tpu.memory_space<vmem>>, vector<1x16xf32>
    tpu.vector_store %arg11[%359, %c0_83], %358 {strides = array<i32>} : memref<8x32xf32, #tpu.memory_space<vmem>>, vector<1x16xf32>,
    %361 = arith.index_cast %329 : i32 to index
    %c0_84 = arith.constant 0 : index
    %362 = vector.load %arg10[%361, %c0_84] : memref<8x64xf32, #tpu.memory_space<vmem>>, vector<1x64xf32>
    %cst_85 = arith.constant dense<0.000000e+00> : vector<1x64xf32>
    %363 = tpu.matmul %326, %12, %cst_85 {dimension_numbers = #tpu.dot_dimension_numbers<[1], [0], [0], [1], [0, 0, 1, 1], [], []>} : vector<1x16xf32>, vector<16x64xf32>, vector<1x64xf32> -> vector<1x64xf32>
    %364 = arith.addf %362, %363 : vector<1x64xf32>
    %365 = vector.extract_strided_slice %364 {offsets = [0, 0], sizes = [1, 16], strides = [1, 1]} : vector<1x64xf32> to vector<1x16xf32>
    %366 = arith.negf %365 : vector<1x16xf32>
    %367 = math.exp %366 : vector<1x16xf32>
    %cst_86 = arith.constant 1.000000e+00 : f32
    %368 = vector.broadcast %cst_86 : f32 to vector<1x16xf32>
    %369 = arith.addf %368, %367 : vector<1x16xf32>
    %370 = arith.divf %368, %369 : vector<1x16xf32>
    %371 = vector.extract_strided_slice %364 {offsets = [0, 16], sizes = [1, 16], strides = [1, 1]} : vector<1x64xf32> to vector<1x16xf32>
    %372 = arith.negf %371 : vector<1x16xf32>
    %373 = math.exp %372 : vector<1x16xf32>
    %cst_87 = arith.constant 1.000000e+00 : f32
    %374 = vector.broadcast %cst_87 : f32 to vector<1x16xf32>
    %375 = arith.addf %374, %373 : vector<1x16xf32>
    %376 = arith.divf %374, %375 : vector<1x16xf32>
    %377 = vector.extract_strided_slice %364 {offsets = [0, 32], sizes = [1, 16], strides = [1, 1]} : vector<1x64xf32> to vector<1x16xf32>
    %378 = math.tanh %377 : vector<1x16xf32>
    %379 = vector.extract_strided_slice %364 {offsets = [0, 48], sizes = [1, 16], strides = [1, 1]} : vector<1x64xf32> to vector<1x16xf32>
    %380 = arith.negf %379 : vector<1x16xf32>
    %381 = math.exp %380 : vector<1x16xf32>
    %cst_88 = arith.constant 1.000000e+00 : f32
    %382 = vector.broadcast %cst_88 : f32 to vector<1x16xf32>
    %383 = arith.addf %382, %381 : vector<1x16xf32>
    %384 = arith.divf %382, %383 : vector<1x16xf32>
    %385 = arith.mulf %376, %324 : vector<1x16xf32>
    %386 = arith.mulf %370, %378 : vector<1x16xf32>
    %387 = arith.addf %385, %386 : vector<1x16xf32>
    %388 = math.tanh %387 : vector<1x16xf32>
    %389 = arith.mulf %384, %388 : vector<1x16xf32>
    %390 = arith.index_cast %329 : i32 to index
    %c16_89 = arith.constant 16 : index
    %391 = vector.load %arg11[%390, %c16_89] : memref<8x32xf32, #tpu.memory_space<vmem>>, vector<1x16xf32>
    tpu.vector_store %arg11[%390, %c16_89], %389 {strides = array<i32>} : memref<8x32xf32, #tpu.memory_space<vmem>>, vector<1x16xf32>,
    %c6_i32 = arith.constant 6 : i32
    %c7_i32_90 = arith.constant 7 : i32
    %392 = arith.subi %c7_i32_90, %c6_i32 : i32
    %393 = arith.index_cast %c6_i32 : i32 to index
    %c0_91 = arith.constant 0 : index
    %394 = vector.load %arg9[%393, %c0_91] : memref<8x64xf32, #tpu.memory_space<vmem>>, vector<1x64xf32>
    %cst_92 = arith.constant dense<0.000000e+00> : vector<1x64xf32>
    %395 = tpu.matmul %358, %11, %cst_92 {dimension_numbers = #tpu.dot_dimension_numbers<[1], [0], [0], [1], [0, 0, 1, 1], [], []>} : vector<1x16xf32>, vector<16x64xf32>, vector<1x64xf32> -> vector<1x64xf32>
    %396 = arith.addf %394, %395 : vector<1x64xf32>
    %397 = vector.extract_strided_slice %396 {offsets = [0, 0], sizes = [1, 16], strides = [1, 1]} : vector<1x64xf32> to vector<1x16xf32>
    %398 = arith.negf %397 : vector<1x16xf32>
    %399 = math.exp %398 : vector<1x16xf32>
    %cst_93 = arith.constant 1.000000e+00 : f32
    %400 = vector.broadcast %cst_93 : f32 to vector<1x16xf32>
    %401 = arith.addf %400, %399 : vector<1x16xf32>
    %402 = arith.divf %400, %401 : vector<1x16xf32>
    %403 = vector.extract_strided_slice %396 {offsets = [0, 16], sizes = [1, 16], strides = [1, 1]} : vector<1x64xf32> to vector<1x16xf32>
    %404 = arith.negf %403 : vector<1x16xf32>
    %405 = math.exp %404 : vector<1x16xf32>
    %cst_94 = arith.constant 1.000000e+00 : f32
    %406 = vector.broadcast %cst_94 : f32 to vector<1x16xf32>
    %407 = arith.addf %406, %405 : vector<1x16xf32>
    %408 = arith.divf %406, %407 : vector<1x16xf32>
    %409 = vector.extract_strided_slice %396 {offsets = [0, 32], sizes = [1, 16], strides = [1, 1]} : vector<1x64xf32> to vector<1x16xf32>
    %410 = math.tanh %409 : vector<1x16xf32>
    %411 = vector.extract_strided_slice %396 {offsets = [0, 48], sizes = [1, 16], strides = [1, 1]} : vector<1x64xf32> to vector<1x16xf32>
    %412 = arith.negf %411 : vector<1x16xf32>
    %413 = math.exp %412 : vector<1x16xf32>
    %cst_95 = arith.constant 1.000000e+00 : f32
    %414 = vector.broadcast %cst_95 : f32 to vector<1x16xf32>
    %415 = arith.addf %414, %413 : vector<1x16xf32>
    %416 = arith.divf %414, %415 : vector<1x16xf32>
    %417 = arith.mulf %408, %356 : vector<1x16xf32>
    %418 = arith.mulf %402, %410 : vector<1x16xf32>
    %419 = arith.addf %417, %418 : vector<1x16xf32>
    %420 = math.tanh %419 : vector<1x16xf32>
    %421 = arith.mulf %416, %420 : vector<1x16xf32>
    %422 = arith.index_cast %c6_i32 : i32 to index
    %c0_96 = arith.constant 0 : index
    %423 = vector.load %arg11[%422, %c0_96] : memref<8x32xf32, #tpu.memory_space<vmem>>, vector<1x16xf32>
    tpu.vector_store %arg11[%422, %c0_96], %421 {strides = array<i32>} : memref<8x32xf32, #tpu.memory_space<vmem>>, vector<1x16xf32>,
    %424 = arith.index_cast %392 : i32 to index
    %c0_97 = arith.constant 0 : index
    %425 = vector.load %arg10[%424, %c0_97] : memref<8x64xf32, #tpu.memory_space<vmem>>, vector<1x64xf32>
    %cst_98 = arith.constant dense<0.000000e+00> : vector<1x64xf32>
    %426 = tpu.matmul %389, %12, %cst_98 {dimension_numbers = #tpu.dot_dimension_numbers<[1], [0], [0], [1], [0, 0, 1, 1], [], []>} : vector<1x16xf32>, vector<16x64xf32>, vector<1x64xf32> -> vector<1x64xf32>
    %427 = arith.addf %425, %426 : vector<1x64xf32>
    %428 = vector.extract_strided_slice %427 {offsets = [0, 0], sizes = [1, 16], strides = [1, 1]} : vector<1x64xf32> to vector<1x16xf32>
    %429 = arith.negf %428 : vector<1x16xf32>
    %430 = math.exp %429 : vector<1x16xf32>
    %cst_99 = arith.constant 1.000000e+00 : f32
    %431 = vector.broadcast %cst_99 : f32 to vector<1x16xf32>
    %432 = arith.addf %431, %430 : vector<1x16xf32>
    %433 = arith.divf %431, %432 : vector<1x16xf32>
    %434 = vector.extract_strided_slice %427 {offsets = [0, 16], sizes = [1, 16], strides = [1, 1]} : vector<1x64xf32> to vector<1x16xf32>
    %435 = arith.negf %434 : vector<1x16xf32>
    %436 = math.exp %435 : vector<1x16xf32>
    %cst_100 = arith.constant 1.000000e+00 : f32
    %437 = vector.broadcast %cst_100 : f32 to vector<1x16xf32>
    %438 = arith.addf %437, %436 : vector<1x16xf32>
    %439 = arith.divf %437, %438 : vector<1x16xf32>
    %440 = vector.extract_strided_slice %427 {offsets = [0, 32], sizes = [1, 16], strides = [1, 1]} : vector<1x64xf32> to vector<1x16xf32>
    %441 = math.tanh %440 : vector<1x16xf32>
    %442 = vector.extract_strided_slice %427 {offsets = [0, 48], sizes = [1, 16], strides = [1, 1]} : vector<1x64xf32> to vector<1x16xf32>
    %443 = arith.negf %442 : vector<1x16xf32>
    %444 = math.exp %443 : vector<1x16xf32>
    %cst_101 = arith.constant 1.000000e+00 : f32
    %445 = vector.broadcast %cst_101 : f32 to vector<1x16xf32>
    %446 = arith.addf %445, %444 : vector<1x16xf32>
    %447 = arith.divf %445, %446 : vector<1x16xf32>
    %448 = arith.mulf %439, %387 : vector<1x16xf32>
    %449 = arith.mulf %433, %441 : vector<1x16xf32>
    %450 = arith.addf %448, %449 : vector<1x16xf32>
    %451 = math.tanh %450 : vector<1x16xf32>
    %452 = arith.mulf %447, %451 : vector<1x16xf32>
    %453 = arith.index_cast %392 : i32 to index
    %c16_102 = arith.constant 16 : index
    %454 = vector.load %arg11[%453, %c16_102] : memref<8x32xf32, #tpu.memory_space<vmem>>, vector<1x16xf32>
    tpu.vector_store %arg11[%453, %c16_102], %452 {strides = array<i32>} : memref<8x32xf32, #tpu.memory_space<vmem>>, vector<1x16xf32>,
    %c7_i32_103 = arith.constant 7 : i32
    %c7_i32_104 = arith.constant 7 : i32
    %455 = arith.subi %c7_i32_104, %c7_i32_103 : i32
    %456 = arith.index_cast %c7_i32_103 : i32 to index
    %c0_105 = arith.constant 0 : index
    %457 = vector.load %arg9[%456, %c0_105] : memref<8x64xf32, #tpu.memory_space<vmem>>, vector<1x64xf32>
    %cst_106 = arith.constant dense<0.000000e+00> : vector<1x64xf32>
    %458 = tpu.matmul %421, %11, %cst_106 {dimension_numbers = #tpu.dot_dimension_numbers<[1], [0], [0], [1], [0, 0, 1, 1], [], []>} : vector<1x16xf32>, vector<16x64xf32>, vector<1x64xf32> -> vector<1x64xf32>
    %459 = arith.addf %457, %458 : vector<1x64xf32>
    %460 = vector.extract_strided_slice %459 {offsets = [0, 0], sizes = [1, 16], strides = [1, 1]} : vector<1x64xf32> to vector<1x16xf32>
    %461 = arith.negf %460 : vector<1x16xf32>
    %462 = math.exp %461 : vector<1x16xf32>
    %cst_107 = arith.constant 1.000000e+00 : f32
    %463 = vector.broadcast %cst_107 : f32 to vector<1x16xf32>
    %464 = arith.addf %463, %462 : vector<1x16xf32>
    %465 = arith.divf %463, %464 : vector<1x16xf32>
    %466 = vector.extract_strided_slice %459 {offsets = [0, 16], sizes = [1, 16], strides = [1, 1]} : vector<1x64xf32> to vector<1x16xf32>
    %467 = arith.negf %466 : vector<1x16xf32>
    %468 = math.exp %467 : vector<1x16xf32>
    %cst_108 = arith.constant 1.000000e+00 : f32
    %469 = vector.broadcast %cst_108 : f32 to vector<1x16xf32>
    %470 = arith.addf %469, %468 : vector<1x16xf32>
    %471 = arith.divf %469, %470 : vector<1x16xf32>
    %472 = vector.extract_strided_slice %459 {offsets = [0, 32], sizes = [1, 16], strides = [1, 1]} : vector<1x64xf32> to vector<1x16xf32>
    %473 = math.tanh %472 : vector<1x16xf32>
    %474 = vector.extract_strided_slice %459 {offsets = [0, 48], sizes = [1, 16], strides = [1, 1]} : vector<1x64xf32> to vector<1x16xf32>
    %475 = arith.negf %474 : vector<1x16xf32>
    %476 = math.exp %475 : vector<1x16xf32>
    %cst_109 = arith.constant 1.000000e+00 : f32
    %477 = vector.broadcast %cst_109 : f32 to vector<1x16xf32>
    %478 = arith.addf %477, %476 : vector<1x16xf32>
    %479 = arith.divf %477, %478 : vector<1x16xf32>
    %480 = arith.mulf %471, %419 : vector<1x16xf32>
    %481 = arith.mulf %465, %473 : vector<1x16xf32>
    %482 = arith.addf %480, %481 : vector<1x16xf32>
    %483 = math.tanh %482 : vector<1x16xf32>
    %484 = arith.mulf %479, %483 : vector<1x16xf32>
    %485 = arith.index_cast %c7_i32_103 : i32 to index
    %c0_110 = arith.constant 0 : index
    %486 = vector.load %arg11[%485, %c0_110] : memref<8x32xf32, #tpu.memory_space<vmem>>, vector<1x16xf32>
    tpu.vector_store %arg11[%485, %c0_110], %484 {strides = array<i32>} : memref<8x32xf32, #tpu.memory_space<vmem>>, vector<1x16xf32>,
    %487 = arith.index_cast %455 : i32 to index
    %c0_111 = arith.constant 0 : index
    %488 = vector.load %arg10[%487, %c0_111] : memref<8x64xf32, #tpu.memory_space<vmem>>, vector<1x64xf32>
    %cst_112 = arith.constant dense<0.000000e+00> : vector<1x64xf32>
    %489 = tpu.matmul %452, %12, %cst_112 {dimension_numbers = #tpu.dot_dimension_numbers<[1], [0], [0], [1], [0, 0, 1, 1], [], []>} : vector<1x16xf32>, vector<16x64xf32>, vector<1x64xf32> -> vector<1x64xf32>
    %490 = arith.addf %488, %489 : vector<1x64xf32>
    %491 = vector.extract_strided_slice %490 {offsets = [0, 0], sizes = [1, 16], strides = [1, 1]} : vector<1x64xf32> to vector<1x16xf32>
    %492 = arith.negf %491 : vector<1x16xf32>
    %493 = math.exp %492 : vector<1x16xf32>
    %cst_113 = arith.constant 1.000000e+00 : f32
    %494 = vector.broadcast %cst_113 : f32 to vector<1x16xf32>
    %495 = arith.addf %494, %493 : vector<1x16xf32>
    %496 = arith.divf %494, %495 : vector<1x16xf32>
    %497 = vector.extract_strided_slice %490 {offsets = [0, 16], sizes = [1, 16], strides = [1, 1]} : vector<1x64xf32> to vector<1x16xf32>
    %498 = arith.negf %497 : vector<1x16xf32>
    %499 = math.exp %498 : vector<1x16xf32>
    %cst_114 = arith.constant 1.000000e+00 : f32
    %500 = vector.broadcast %cst_114 : f32 to vector<1x16xf32>
    %501 = arith.addf %500, %499 : vector<1x16xf32>
    %502 = arith.divf %500, %501 : vector<1x16xf32>
    %503 = vector.extract_strided_slice %490 {offsets = [0, 32], sizes = [1, 16], strides = [1, 1]} : vector<1x64xf32> to vector<1x16xf32>
    %504 = math.tanh %503 : vector<1x16xf32>
    %505 = vector.extract_strided_slice %490 {offsets = [0, 48], sizes = [1, 16], strides = [1, 1]} : vector<1x64xf32> to vector<1x16xf32>
    %506 = arith.negf %505 : vector<1x16xf32>
    %507 = math.exp %506 : vector<1x16xf32>
    %cst_115 = arith.constant 1.000000e+00 : f32
    %508 = vector.broadcast %cst_115 : f32 to vector<1x16xf32>
    %509 = arith.addf %508, %507 : vector<1x16xf32>
    %510 = arith.divf %508, %509 : vector<1x16xf32>
    %511 = arith.mulf %502, %450 : vector<1x16xf32>
    %512 = arith.mulf %496, %504 : vector<1x16xf32>
    %513 = arith.addf %511, %512 : vector<1x16xf32>
    %514 = math.tanh %513 : vector<1x16xf32>
    %515 = arith.mulf %510, %514 : vector<1x16xf32>
    %516 = arith.index_cast %455 : i32 to index
    %c16_116 = arith.constant 16 : index
    %517 = vector.load %arg11[%516, %c16_116] : memref<8x32xf32, #tpu.memory_space<vmem>>, vector<1x16xf32>
    tpu.vector_store %arg11[%516, %c16_116], %515 {strides = array<i32>} : memref<8x32xf32, #tpu.memory_space<vmem>>, vector<1x16xf32>,
    %c8_i32 = arith.constant 8 : i32
    %c0_117 = arith.constant 0 : index
    %c0_118 = arith.constant 0 : index
    %518 = vector.load %arg11[%c0_117, %c0_118] : memref<8x32xf32, #tpu.memory_space<vmem>>, vector<8x32xf32>
    %519 = arith.truncf %518 : vector<8x32xf32> to vector<8x32xbf16>
    %c0_119 = arith.constant 0 : index
    %c0_120 = arith.constant 0 : index
    %520 = vector.load %arg5[%c0_119, %c0_120] : memref<32x32xbf16, #tpu.memory_space<vmem>>, vector<32x32xbf16>
    %cst_121 = arith.constant dense<0.000000e+00> : vector<8x32xf32>
    %521 = tpu.matmul %519, %520, %cst_121 {dimension_numbers = #tpu.dot_dimension_numbers<[1], [0], [0], [1], [0, 0, 1, 1], [], []>} : vector<8x32xbf16>, vector<32x32xbf16>, vector<8x32xf32> -> vector<8x32xf32>
    %c0_122 = arith.constant 0 : index
    %c0_123 = arith.constant 0 : index
    %522 = vector.load %arg6[%c0_122, %c0_123] : memref<1x32xf32, #tpu.memory_space<vmem>>, vector<1x32xf32>
    %523 = vector.broadcast %522 : vector<1x32xf32> to vector<8x32xf32>
    %524 = arith.addf %521, %523 : vector<8x32xf32>
    %525 = math.tanh %524 : vector<8x32xf32>
    %c0_124 = arith.constant 0 : index
    %c0_125 = arith.constant 0 : index
    %526 = vector.load %arg7[%c0_124, %c0_125] : memref<1x32xf32, #tpu.memory_space<vmem>>, vector<1x32xf32>
    %527 = vector.broadcast %526 : vector<1x32xf32> to vector<8x32xf32>
    %528 = arith.mulf %525, %527 : vector<8x32xf32>
    %cst_126 = arith.constant dense<0.000000e+00> : vector<8xf32>
    %529 = vector.multi_reduction <add>, %528, %cst_126 [1] : vector<8x32xf32> to vector<8xf32>
    %530 = vector.shape_cast %529 : vector<8xf32> to vector<8x1xf32>
    %cst_127 = arith.constant dense<0xFF800000> : vector<1xf32>
    %531 = vector.multi_reduction <maximumf>, %530, %cst_127 [0] : vector<8x1xf32> to vector<1xf32>
    %532 = vector.shape_cast %531 : vector<1xf32> to vector<1x1xf32>
    %533 = vector.broadcast %532 : vector<1x1xf32> to vector<8x1xf32>
    %534 = arith.subf %530, %533 : vector<8x1xf32>
    %535 = math.exp %534 : vector<8x1xf32>
    %cst_128 = arith.constant dense<0.000000e+00> : vector<1xf32>
    %536 = vector.multi_reduction <add>, %535, %cst_128 [0] : vector<8x1xf32> to vector<1xf32>
    %537 = vector.shape_cast %536 : vector<1xf32> to vector<1x1xf32>
    %538 = vector.broadcast %537 : vector<1x1xf32> to vector<8x1xf32>
    %539 = arith.divf %535, %538 : vector<8x1xf32>
    %540 = vector.broadcast %539 : vector<8x1xf32> to vector<8x32xf32>
    %541 = arith.mulf %518, %540 : vector<8x32xf32>
    %cst_129 = arith.constant dense<0.000000e+00> : vector<32xf32>
    %542 = vector.multi_reduction <add>, %541, %cst_129 [0] : vector<8x32xf32> to vector<32xf32>
    %543 = vector.shape_cast %542 : vector<32xf32> to vector<1x32xf32>
    %c0_130 = arith.constant 0 : index
    %c0_131 = arith.constant 0 : index
    %544 = vector.load %arg8[%c0_130, %c0_131] : memref<1x32xf32, #tpu.memory_space<vmem>>, vector<1x32xf32>
    tpu.vector_store %arg8[%c0_130, %c0_131], %543 {strides = array<i32>} : memref<1x32xf32, #tpu.memory_space<vmem>>, vector<1x32xf32>,
    return
  }
}

</mosaic_0001>

<bundles_post_ra>
// kernel: tpu_custom_call.1
= control target key start
LH: loop header
LB: loop body
LE: loop exit
PB: predicated region body
PF: predicated region fallthrough
CT: control target
= control target key end

     0   :  { %13 = vsyncpa [#allocation6], 0  ;;  %s2024_s0 = inlined_call_operand.hbm [shape: f32[8,32], index: 0, kind: input, shape index: {}]   ;;  %s2025_s1 = inlined_call_operand.hbm [shape: bf16[32,128], index: 1, kind: input, shape index: {}]   ;;  %s2026_s2 = inlined_call_operand.vmem [shape: f32[1,128], index: 2, kind: input, shape index: {}]   ;;  %s2027_s3 = inlined_call_operand.hbm [shape: f32[16,64], index: 3, kind: input, shape index: {}]   ;;  %s2028_s4 = inlined_call_operand.hbm [shape: f32[16,64], index: 4, kind: input, shape index: {}]   ;;  %s2029_s5 = inlined_call_operand.hbm [shape: bf16[32,32], index: 5, kind: input, shape index: {}]   ;;  %s2030_s6 = inlined_call_operand.vmem [shape: f32[1,32], index: 6, kind: input, shape index: {}]   ;;  %s2031_s7 = inlined_call_operand.vmem [shape: f32[1,32], index: 7, kind: input, shape index: {}]   ;;  %s2032_s8 = inlined_call_operand.hbm [shape: f32[1,32], index: 8, kind: output, shape index: {}]  }
   0x1   :  { %14 = vsyncpa [#allocation9], 0 }
   0x2   :  { %15 = vsyncpa [#allocation12], 0  ;;  %s32_s29 = sshll.u32 %s2025_s1, 4  ;;  %s33_s29 = int_to_ptr.hbm [resolvable:$true] %s32_s29 }
   0x3   :  { %16 = vsyncpa [#allocation7], 0  ;;  %s1691_s30 = smov [#allocation8]   ;;  %s1692_s10 = smov 64  }
   0x4   :  { %s34_s9 = sshll.u32 %s1691_s30, 4  ;;  %s1693_s11 = smov 4   ;;  %s35_s9 = int_to_ptr.vmem [resolvable:$true] %s34_s9 }
   0x5   :  { %40 = dma.hbm_to_vmem [thread:$0]  %s33_s29, 256, %s35_s9, [#allocation9], %s1692_s10, %s1692_s10, %s1693_s11  }
   0x6   :  { %s60_s14 = sshll.u32 %s2028_s4, 4  ;;  %s1694_s15 = smov [#allocation11]   ;;  %s61_s14 = int_to_ptr.hbm [resolvable:$true] %s60_s14 }
   0x7   :  { %s62_s16 = sshll.u32 %s1694_s15, 4  ;;  %s22_s18 = sshll.u32 %s2024_s0, 4  ;;  %s63_s16 = int_to_ptr.vmem [resolvable:$true] %s62_s16  ;;  %s23_s18 = int_to_ptr.hbm [resolvable:$true] %s22_s18 }
   0x8   :  { %s1695_s19 = smov 128   ;;  %s1696_s20 = smov 8  }
   0x9   :  { %68 = dma.hbm_to_vmem [thread:$0]  %s61_s14, 256, %s63_s16, [#allocation12], %s1695_s19, %s1695_s19, %s1696_s20  }
   0xa   :  { %s47_s23 = sshll.u32 %s2027_s3, 4  ;;  %s1697_s24 = smov [#allocation5]   ;;  %s48_s23 = int_to_ptr.hbm [resolvable:$true] %s47_s23 }
   0xb   :  { %s24_s25 = sshll.u32 %s1697_s24, 4  ;;  %s1698_s4 = smov [#allocation10]   ;;  %s25_s25 = int_to_ptr.vmem [resolvable:$true] %s24_s25 }
   0xc   :  { %27 = dma.hbm_to_vmem [thread:$0]  %s23_s18, 128, %s25_s25, [#allocation6]  }
   0xd   :  { %s49_s26 = sshll.u32 %s1698_s4, 4  ;;  %s73_s0 = sshll.u32 %s2029_s5, 4  ;;  %s50_s26 = int_to_ptr.vmem [resolvable:$true] %s49_s26  ;;  %s74_s0 = int_to_ptr.hbm [resolvable:$true] %s73_s0 }
   0xe   :  { %55 = dma.hbm_to_vmem [thread:$0]  %s48_s23, 256, %s50_s26, [#allocation9], %s1695_s19, %s1695_s19, %s1696_s20  }
   0xf   :  { %s1699_s29 = smov [#allocation13]  }
  0x10   :  { %s75_s30 = sshll.u32 %s1699_s29, 4  ;;  %s76_s30 = int_to_ptr.vmem [resolvable:$true] %s75_s30 }
  0x11   :  { %81 = dma.hbm_to_vmem [thread:$0]  %s74_s0, 256, %s76_s30, [#allocation12], %s1692_s10, %s1692_s10, %s1693_s11  }
  0x12   :  { %1683 = dma.done.wait [#allocation6], 128  }
  0x13   :  { %1684 = vsyncadd [#allocation6], 4294967168 }
  0x14   :  { %1685 = dma.done.wait [#allocation9], 512  }
  0x15   :  { %1686 = vsyncadd [#allocation9], 4294966784 }
  0x16   :  { %1687 = dma.done.wait [#allocation12], 512  }
  0x17   :  { %1688 = vsyncadd [#allocation12], 4294966784  ;;  %v1384_v0 = vld [vmem:[#allocation8 + $0x8] sm:$0xff]  ;;  %v1383_v1 = vld [vmem:[#allocation8] sm:$0xff]  ;;  %v1700_v8 = vmov 0.0   ;;  %vm129_vm0 = vcmask 261120  }
  0x18   :  { %v1772_v2 = vld [vmem:[#allocation10 + $0x8] sm:$0xff]  ;;  %v1774_v3 = vld [vmem:[#allocation10] sm:$0xff]  ;;  %v1776_v4 = vld [vmem:[#allocation11 + $0x8] sm:$0xff]  ;;  %139 = vmatpush.bf16.msra.mxu0 %v1384_v0  ;;  %vm146_vm1 = vcmask 523264   ;;  %s1701_s9 = smov 96   ;;  %s1704_s11 = smov 80  }
  0x19   :  { %v107_v5 = vld [vmem:[#allocation5] sm:$0xff]  ;;  %176 = vmatpush.msra.mxu1 %v1772_v2  ;;  %v1779_v6 = vld [vmem:[#allocation11] sm:$0xff]  ;;  %241 = vmatpush.msra.mxu2 %v1776_v4  ;;  %vm224_vm10 = vcmask 122880   ;;  %vm158_vm11 = vcmask 130048   ;;  %s1323_s1 = sshll.u32 %s2032_s8, 4  ;;  %s1324_s1 = int_to_ptr.hbm [resolvable:$true] %s1323_s1 }
  0x1a   :  { %510 = vmatpush.msra.mxu3 %v1776_v4  ;;  %v108_v7 = vpack.c.bf16 %v107_v5, %v107_v5  ;;  %v1402_v9 = vld [vmem:[%s2026_s2] ss:$0 sm:$0xff]  ;;  %s1702_s2 = smov 16  }
  0x1b   :  { %177 = vmatpush.msra.mxu1 %v1774_v3  ;;  %242 = vmatpush.msra.mxu2 %v1779_v6 }
  0x1c   :  { %178 = vmatmul.f32.vlgmr.msra.gmra.mxu1 %v1700_v8  ;;  %140 = vmatpush.bf16.msra.mxu0 %v1383_v1 }
  0x1d   :  { %243 = vmatmul.f32.vlgmr.msra.gmra.mxu2 %v1700_v8  ;;  %376 = vmatpush.msrb.mxu1 %v1776_v4 }
  0x1e   :  { %442 = vmatpush.msrb.mxu2 %v1772_v2  ;;  %511 = vmatpush.msra.mxu3 %v1779_v6 }
  0x1f   :  { %1343 = vmatmul.msk.bf16.vlgmr.msra.gmra.mxu0 %vm129_vm0, %v108_v7  ;;  %377 = vmatpush.msrb.mxu1 %v1779_v6 }
  0x20   :  { %308 = vmatpush.msrb.mxu0 %v1772_v2  ;;  %443 = vmatpush.msrb.mxu2 %v1774_v3 }
  0x21   :  { %576 = vmatpush.msra.mxu1 %v1772_v2  ;;  %710 = vmatpush.msrb.mxu3 %v1772_v2 }
  0x22   :  { %309 = vmatpush.msrb.mxu0 %v1774_v3  ;;  %644 = vmatpush.msra.mxu2 %v1776_v4 }
  0x23   :  { %577 = vmatpush.msra.mxu1 %v1774_v3  ;;  %711 = vmatpush.msrb.mxu3 %v1774_v3 }
  0x24   :  { %778 = vmatpush.msra.mxu0 %v1776_v4  ;;  %645 = vmatpush.msra.mxu2 %v1779_v6 }
  0x26   :  { %779 = vmatpush.msra.mxu0 %v1779_v6 }
  0x99   :  { %v179_v13 = vpop.f32.mrf.mxu1 }
  0x9c   :  { %v142_v10 = vpop.f32.mrf.mxu0 }
  0x9d   :  { %v143_v11 = vadd.f32 %v1402_v9, %v142_v10 }
  0x9f   :  { %147 = vst.msk [vmem:[#allocation2] sm:$0xff] %vm146_vm1, %v143_v11  ;;  %149 = vrot.lane.b32.xlu0 %v143_v11, %s1692_s10  ;;  %s1703_s10 = smov 32  }
  0xa0   :  { %v244_v24 = vpop.f32.mrf.mxu2 }
  0xa4   :  { %v144_v12 = vpop.f32.mrf.mxu0 }
  0xa6   :  { %v157_v14 = vld [vmem:[#allocation2] sm:$0x1]  ;;  %v291_v5 = vld [vmem:[#allocation2 + $0x1] sm:$0x1] }
  0xa7   :  { %v182_v15 = vadd.f32 %v179_v13, %v157_v14 }
  0xa9   :  { %1405 = vtanh.f32 %v182_v15  ;;  %v1344_v17 = vmul.f32 -1.442695, %v182_v15 }
  0xab   :  { %1407 = vpow2.f32 %v1344_v17 }
  0xaf   :  { %v1406_v16 = vpop.eup %1405 }
  0xb0   :  { %205 = vrot.lane.b32.xlu1 %v1406_v16, %s1701_s9 }
  0xb1   :  { %v1408_v18 = vpop.eup %1407 }
  0xb2   :  { %v186_v19 = vadd.f32 1.0, %v1408_v18 }
  0xb4   :  { %1409 = vrcp.f32 %v186_v19  ;;  %v198_v29 = vand.u32 2147483648, %v186_v19  ;;  %vm192_vm3 = vweird.f32 %v186_v19  ;;  %v196_v30 = vand.u32 2147483647, %v186_v19 }
  0xb6   :  { %v199_v32 = vor.u32 1.1754944e-38, %v198_v29  ;;  %vm197_vm5 = vcmp.eq.f32.partialorder %v196_v30, 8.507059e+37 }
  0xba   :  { %v1410_v20 = vpop.eup %1409 }
  0xbb   :  { %v188_v21 = vmul.f32 %v1410_v20, %v186_v19  ;;  %vm193_vm2 = vweird.f32 %v1410_v20 }
  0xbc   :  { %vm194_vm4 = vmor %vm192_vm3, %vm193_vm2 }
  0xbd   :  { %v189_v23 = vsub.f32 1.0, %v188_v21 }
  0xbf   :  { %v190_v25 = vmul.f32 %v1410_v20, %v189_v23 }
  0xc1   :  { %v191_v28 = vadd.f32 %v1410_v20, %v190_v25 }
  0xc3   :  { %v195_v31 = vsel %vm194_vm4, %v1410_v20, %v191_v28 }
  0xc4   :  { %v200_v35 = vsel %vm197_vm5, %v199_v32, %v195_v31 }
  0xc5   :  { %v203_v40 = vmul.f32 0.0, %v200_v35 }
 0x111   :  { %v150_v22 = vpop.permute.xlu0 %149 }
 0x112   :  { %152 = vst.msk [vmem:[#allocation3] sm:$0xff] %vm146_vm1, %v150_v22 }
 0x119   :  { %v226_v26 = vld [vmem:[#allocation3 + $0x7] sm:$0x1]  ;;  %v357_v15 = vld [vmem:[#allocation3 + $0x6] sm:$0x1] }
 0x11a   :  { %v247_v27 = vadd.f32 %v244_v24, %v226_v26 }
 0x11c   :  { %1411 = vtanh.f32 %v247_v27  ;;  %v1345_v37 = vmul.f32 -1.442695, %v247_v27 }
 0x11e   :  { %1413 = vpow2.f32 %v1345_v37 }
 0x122   :  { %v1412_v33 = vpop.eup %1411  ;;  %v206_v34 = vpop.permute.xlu1 %205 }
 0x123   :  { %v208_v36 = vmul.f32 %v206_v34, %v200_v35  ;;  %270 = vrot.lane.b32.xlu0 %v1412_v33, %s1701_s9 }
 0x124   :  { %v1414_v38 = vpop.eup %1413 }
 0x125   :  { %210 = vrot.lane.b32.xlu2 %v208_v36, %s1702_s2  ;;  %v251_v39 = vadd.f32 1.0, %v1414_v38 }
 0x127   :  { %1415 = vrcp.f32 %v251_v39  ;;  %v263_v49 = vand.u32 2147483648, %v251_v39  ;;  %vm257_vm7 = vweird.f32 %v251_v39  ;;  %v261_v50 = vand.u32 2147483647, %v251_v39 }
 0x129   :  { %v264_v52 = vor.u32 1.1754944e-38, %v263_v49  ;;  %vm262_vm9 = vcmp.eq.f32.partialorder %v261_v50, 8.507059e+37 }
 0x12d   :  { %v1416_v41 = vpop.eup %1415 }
 0x12e   :  { %v253_v44 = vmul.f32 %v1416_v41, %v251_v39  ;;  %vm258_vm6 = vweird.f32 %v1416_v41 }
 0x12f   :  { %vm259_vm8 = vmor %vm257_vm7, %vm258_vm6 }
 0x130   :  { %v254_v45 = vsub.f32 1.0, %v253_v44 }
 0x132   :  { %v255_v47 = vmul.f32 %v1416_v41, %v254_v45 }
 0x134   :  { %v256_v48 = vadd.f32 %v1416_v41, %v255_v47 }
 0x136   :  { %v260_v51 = vsel %vm259_vm8, %v1416_v41, %v256_v48 }
 0x137   :  { %v265_v54 = vsel %vm262_vm9, %v264_v52, %v260_v51 }
 0x138   :  { %v268_v56 = vmul.f32 0.0, %v265_v54 }
 0x17f   :  { %v211_v42 = vpop.permute.xlu2 %210 }
 0x180   :  { %v1810_v43 = vadd.f32 %v211_v42, %v203_v40 }
 0x182   :  { %1417 = vtanh.f32 %v1810_v43 }
 0x188   :  { %v1418_v46 = vpop.eup %1417 }
 0x189   :  { %216 = vrot.lane.b32.xlu0 %v1418_v46, %s1703_s10 }
 0x195   :  { %v271_v53 = vpop.permute.xlu0 %270 }
 0x196   :  { %v273_v55 = vmul.f32 %v271_v53, %v265_v54 }
 0x198   :  { %275 = vrot.lane.b32.xlu1 %v273_v55, %s1702_s2 }
 0x1fb   :  { %v217_v60 = vpop.permute.xlu0 %216 }
 0x1fc   :  { %v219_v61 = vmul.f32 %v217_v60, %v200_v35 }
 0x20a   :  { %v276_v57 = vpop.permute.xlu1 %275 }
 0x20b   :  { %v1815_v58 = vadd.f32 %v276_v57, %v268_v56 }
 0x20d   :  { %1419 = vtanh.f32 %v1815_v58 }
 0x213   :  { %v1420_v59 = vpop.eup %1419 }
 0x214   :  { %281 = vrot.lane.b32.xlu2 %v1420_v59, %s1703_s10 }
 0x21c   :  { %221 = vrot.lane.b32.xlu2 %v219_v61, %s1704_s11 }
 0x26e   :  { %v282_v62 = vpop.permute.xlu2 %281 }
 0x26f   :  { %v1820_v63 = vmul.f32 %v282_v62, %v265_v54 }
 0x271   :  { %358 = vrot.lane.b32.xlu1 %v1820_v63, %s1704_s11 }
 0x276   :  { %v222_v0 = vpop.permute.xlu2 %221 }
 0x277   :  { %225 = vst.msk [vmem:[#allocation4] sm:$0x1] %vm224_vm10, %v222_v0  ;;  %1346 = vmatmul.msk.f32.vlgmr.msrb.gmra.mxu0 %vm158_vm11, %v222_v0 }
 0x278   :  { %1046 = vmatpush.msrb.mxu0 %v1776_v4 }
 0x27a   :  { %1047 = vmatpush.msrb.mxu0 %v1779_v6 }
 0x2e3   :  { %v359_v1 = vpop.permute.xlu1 %358 }
 0x2e4   :  { %1348 = vmatmul.msk.f32.vlgmr.msrb.gmra.mxu1 %vm158_vm11, %v359_v1 }
 0x2e5   :  { %844 = vmatpush.msrb.mxu1 %v1772_v2 }
 0x2e7   :  { %845 = vmatpush.msrb.mxu1 %v1774_v3 }
 0x2f4   :  { %v311_v7 = vpop.f32.mrf.mxu0 }
 0x2f5   :  { %v314_v8 = vadd.f32 %v311_v7, %v291_v5 }
 0x2f7   :  { %1421 = vtanh.f32 %v314_v8  ;;  %v1347_v10 = vmul.f32 -1.442695, %v314_v8  ;;  %v491_v8 = vld [vmem:[#allocation3 + $0x5] sm:$0x1] }
 0x2f9   :  { %1423 = vpow2.f32 %v1347_v10 }
 0x2fd   :  { %v1422_v9 = vpop.eup %1421 }
 0x2fe   :  { %337 = vrot.lane.b32.xlu1 %v1422_v9, %s1701_s9 }
 0x2ff   :  { %v1424_v11 = vpop.eup %1423 }
 0x300   :  { %v318_v12 = vadd.f32 1.0, %v1424_v11 }
 0x302   :  { %1425 = vrcp.f32 %v318_v12  ;;  %v330_v22 = vand.u32 2147483648, %v318_v12  ;;  %vm324_vm13 = vweird.f32 %v318_v12  ;;  %v328_v23 = vand.u32 2147483647, %v318_v12 }
 0x304   :  { %v331_v25 = vor.u32 1.1754944e-38, %v330_v22  ;;  %vm329_vm15 = vcmp.eq.f32.partialorder %v328_v23, 8.507059e+37 }
 0x308   :  { %v1426_v13 = vpop.eup %1425 }
 0x309   :  { %v320_v14 = vmul.f32 %v1426_v13, %v318_v12  ;;  %vm325_vm12 = vweird.f32 %v1426_v13 }
 0x30a   :  { %vm326_vm14 = vmor %vm324_vm13, %vm325_vm12 }
 0x30b   :  { %v321_v17 = vsub.f32 1.0, %v320_v14 }
 0x30d   :  { %v322_v19 = vmul.f32 %v1426_v13, %v321_v17 }
 0x30f   :  { %v323_v20 = vadd.f32 %v1426_v13, %v322_v19 }
 0x311   :  { %v327_v24 = vsel %vm326_vm14, %v1426_v13, %v323_v20 }
 0x312   :  { %v332_v27 = vsel %vm329_vm15, %v331_v25, %v327_v24 }
 0x313   :  { %v335_v45 = vmul.f32 %v332_v27, %v1810_v43 }
 0x361   :  { %v379_v16 = vpop.f32.mrf.mxu1 }
 0x362   :  { %v382_v18 = vadd.f32 %v379_v16, %v357_v15 }
 0x364   :  { %1427 = vtanh.f32 %v382_v18  ;;  %v1349_v29 = vmul.f32 -1.442695, %v382_v18 }
 0x366   :  { %1429 = vpow2.f32 %v1349_v29 }
 0x36a   :  { %v1428_v21 = vpop.eup %1427 }
 0x36b   :  { %405 = vrot.lane.b32.xlu0 %v1428_v21, %s1701_s9 }
 0x36c   :  { %v1430_v30 = vpop.eup %1429 }
 0x36d   :  { %v386_v31 = vadd.f32 1.0, %v1430_v30 }
 0x36f   :  { %1431 = vrcp.f32 %v386_v31  ;;  %v398_v37 = vand.u32 2147483648, %v386_v31  ;;  %vm392_vm2 = vweird.f32 %v386_v31  ;;  %v396_v38 = vand.u32 2147483647, %v386_v31 }
 0x370   :  { %v338_v26 = vpop.permute.xlu1 %337 }
 0x371   :  { %v340_v28 = vmul.f32 %v338_v26, %v332_v27  ;;  %v399_v40 = vor.u32 1.1754944e-38, %v398_v37  ;;  %vm397_vm4 = vcmp.eq.f32.partialorder %v396_v38, 8.507059e+37 }
 0x373   :  { %342 = vrot.lane.b32.xlu0 %v340_v28, %s1702_s2 }
 0x375   :  { %v1432_v32 = vpop.eup %1431 }
 0x376   :  { %v388_v33 = vmul.f32 %v1432_v32, %v386_v31  ;;  %vm393_vm1 = vweird.f32 %v1432_v32 }
 0x377   :  { %vm394_vm3 = vmor %vm392_vm2, %vm393_vm1 }
 0x378   :  { %v389_v34 = vsub.f32 1.0, %v388_v33 }
 0x37a   :  { %v390_v35 = vmul.f32 %v1432_v32, %v389_v34 }
 0x37c   :  { %v391_v36 = vadd.f32 %v1432_v32, %v390_v35 }
 0x37e   :  { %v395_v39 = vsel %vm394_vm3, %v1432_v32, %v391_v36 }
 0x37f   :  { %v400_v41 = vsel %vm397_vm4, %v399_v40, %v395_v39 }
 0x380   :  { %v403_v49 = vmul.f32 %v400_v41, %v1815_v58  ;;  %v425_v58 = vld [vmem:[#allocation2 + $0x2] sm:$0x1] }
 0x3dd   :  { %v406_v42 = vpop.permute.xlu0 %405 }
 0x3de   :  { %v408_v44 = vmul.f32 %v406_v42, %v400_v41 }
 0x3e0   :  { %410 = vrot.lane.b32.xlu2 %v408_v44, %s1702_s2 }
 0x3e5   :  { %v343_v46 = vpop.permute.xlu0 %342 }
 0x3e6   :  { %v1836_v47 = vadd.f32 %v343_v46, %v335_v45 }
 0x3e8   :  { %1433 = vtanh.f32 %v1836_v47 }
 0x3ee   :  { %v1434_v48 = vpop.eup %1433 }
 0x3ef   :  { %348 = vrot.lane.b32.xlu2 %v1434_v48, %s1703_s10 }
 0x43a   :  { %v411_v50 = vpop.permute.xlu2 %410 }
 0x43b   :  { %v1841_v51 = vadd.f32 %v411_v50, %v403_v49 }
 0x43d   :  { %1435 = vtanh.f32 %v1841_v51 }
 0x443   :  { %v1436_v52 = vpop.eup %1435 }
 0x444   :  { %416 = vrot.lane.b32.xlu1 %v1436_v52, %s1703_s10  ;;  %v559_v52 = vld [vmem:[#allocation2 + $0x3] sm:$0x1] }
 0x449   :  { %v349_v53 = vpop.permute.xlu2 %348 }
 0x44a   :  { %v351_v43 = vmul.f32 %v349_v53, %v332_v27 }
 0x44c   :  { %353 = vrot.lane.b32.xlu1 %v351_v43, %s1704_s11 }
 0x4b6   :  { %v417_v54 = vpop.permute.xlu1 %416 }
 0x4b7   :  { %v1846_v55 = vmul.f32 %v417_v54, %v400_v41 }
 0x4b9   :  { %492 = vrot.lane.b32.xlu0 %v1846_v55, %s1704_s11 }
 0x4be   :  { %v354_v56 = vpop.permute.xlu1 %353 }
 0x4bf   :  { %356 = vst.msk [vmem:[#allocation4 + $0x1] sm:$0x1] %vm224_vm10, %v354_v56  ;;  %1350 = vmatmul.msk.f32.vlgmr.msrb.gmra.mxu2 %vm158_vm11, %v354_v56 }
 0x4c0   :  { %912 = vmatpush.msrb.mxu2 %v1776_v4 }
 0x4c2   :  { %913 = vmatpush.msrb.mxu2 %v1779_v6 }
 0x52b   :  { %v493_v57 = vpop.permute.xlu0 %492 }
 0x52c   :  { %1352 = vmatmul.msk.f32.vlgmr.msra.gmra.mxu3 %vm158_vm11, %v493_v57 }
 0x52d   :  { %978 = vmatpush.msra.mxu3 %v1772_v2 }
 0x52f   :  { %979 = vmatpush.msra.mxu3 %v1774_v3 }
 0x542   :  { %v445_v59 = vpop.f32.mrf.mxu2 }
 0x543   :  { %v448_v60 = vadd.f32 %v445_v59, %v425_v58 }
 0x545   :  { %1437 = vtanh.f32 %v448_v60  ;;  %v1351_v62 = vmul.f32 -1.442695, %v448_v60 }
 0x547   :  { %1439 = vpow2.f32 %v1351_v62 }
 0x54b   :  { %v1438_v61 = vpop.eup %1437 }
 0x54c   :  { %471 = vrot.lane.b32.xlu0 %v1438_v61, %s1701_s9 }
 0x54d   :  { %v1440_v0 = vpop.eup %1439 }
 0x54e   :  { %v452_v1 = vadd.f32 1.0, %v1440_v0 }
 0x550   :  { %1441 = vrcp.f32 %v452_v1  ;;  %v464_v15 = vand.u32 2147483648, %v452_v1  ;;  %vm458_vm6 = vweird.f32 %v452_v1  ;;  %v462_v16 = vand.u32 2147483647, %v452_v1 }
 0x552   :  { %v465_v18 = vor.u32 1.1754944e-38, %v464_v15  ;;  %vm463_vm8 = vcmp.eq.f32.partialorder %v462_v16, 8.507059e+37 }
 0x556   :  { %v1442_v5 = vpop.eup %1441 }
 0x557   :  { %v454_v7 = vmul.f32 %v1442_v5, %v452_v1  ;;  %vm459_vm5 = vweird.f32 %v1442_v5 }
 0x558   :  { %vm460_vm7 = vmor %vm458_vm6, %vm459_vm5 }
 0x559   :  { %v455_v10 = vsub.f32 1.0, %v454_v7 }
 0x55b   :  { %v456_v12 = vmul.f32 %v1442_v5, %v455_v10 }
 0x55d   :  { %v457_v13 = vadd.f32 %v1442_v5, %v456_v12 }
 0x55f   :  { %v461_v17 = vsel %vm460_vm7, %v1442_v5, %v457_v13 }
 0x560   :  { %v466_v19 = vsel %vm463_vm8, %v465_v18, %v461_v17 }
 0x561   :  { %v469_v37 = vmul.f32 %v466_v19, %v1836_v47 }
 0x5af   :  { %v513_v9 = vpop.f32.mrf.mxu3 }
 0x5b0   :  { %v516_v11 = vadd.f32 %v513_v9, %v491_v8 }
 0x5b2   :  { %1443 = vtanh.f32 %v516_v11  ;;  %v1353_v22 = vmul.f32 -1.442695, %v516_v11 }
 0x5b4   :  { %1445 = vpow2.f32 %v1353_v22 }
 0x5b8   :  { %v1444_v14 = vpop.eup %1443 }
 0x5b9   :  { %539 = vrot.lane.b32.xlu2 %v1444_v14, %s1701_s9 }
 0x5ba   :  { %v1446_v23 = vpop.eup %1445 }
 0x5bb   :  { %v520_v24 = vadd.f32 1.0, %v1446_v23 }
 0x5bd   :  { %1447 = vrcp.f32 %v520_v24  ;;  %v532_v30 = vand.u32 2147483648, %v520_v24  ;;  %vm526_vm12 = vweird.f32 %v520_v24  ;;  %v530_v31 = vand.u32 2147483647, %v520_v24 }
 0x5be   :  { %v472_v20 = vpop.permute.xlu0 %471 }
 0x5bf   :  { %v474_v21 = vmul.f32 %v472_v20, %v466_v19  ;;  %v533_v33 = vor.u32 1.1754944e-38, %v532_v30  ;;  %vm531_vm14 = vcmp.eq.f32.partialorder %v530_v31, 8.507059e+37 }
 0x5c1   :  { %476 = vrot.lane.b32.xlu2 %v474_v21, %s1702_s2 }
 0x5c3   :  { %v1448_v25 = vpop.eup %1447 }
 0x5c4   :  { %v522_v26 = vmul.f32 %v1448_v25, %v520_v24  ;;  %vm527_vm9 = vweird.f32 %v1448_v25 }
 0x5c5   :  { %vm528_vm13 = vmor %vm526_vm12, %vm527_vm9 }
 0x5c6   :  { %v523_v27 = vsub.f32 1.0, %v522_v26 }
 0x5c8   :  { %v524_v28 = vmul.f32 %v1448_v25, %v523_v27 }
 0x5ca   :  { %v525_v29 = vadd.f32 %v1448_v25, %v524_v28 }
 0x5cc   :  { %v529_v32 = vsel %vm528_vm13, %v1448_v25, %v525_v29 }
 0x5cd   :  { %v534_v35 = vsel %vm531_vm14, %v533_v33, %v529_v32 }
 0x5ce   :  { %v537_v41 = vmul.f32 %v534_v35, %v1841_v51 }
 0x613   :  { %v540_v34 = vpop.permute.xlu2 %539 }
 0x614   :  { %v542_v36 = vmul.f32 %v540_v34, %v534_v35 }
 0x616   :  { %544 = vrot.lane.b32.xlu1 %v542_v36, %s1702_s2 }
 0x61b   :  { %v477_v38 = vpop.permute.xlu2 %476 }
 0x61c   :  { %v1862_v39 = vadd.f32 %v477_v38, %v469_v37 }
 0x61e   :  { %1449 = vtanh.f32 %v1862_v39 }
 0x624   :  { %v1450_v40 = vpop.eup %1449 }
 0x625   :  { %482 = vrot.lane.b32.xlu1 %v1450_v40, %s1703_s10 }
 0x688   :  { %v545_v42 = vpop.permute.xlu1 %544 }
 0x689   :  { %v1867_v44 = vadd.f32 %v545_v42, %v537_v41  ;;  %v693_v41 = vld [vmem:[#allocation2 + $0x4] sm:$0x1] }
 0x68b   :  { %1451 = vtanh.f32 %v1867_v44 }
 0x691   :  { %v1452_v45 = vpop.eup %1451 }
 0x692   :  { %550 = vrot.lane.b32.xlu0 %v1452_v45, %s1703_s10 }
 0x697   :  { %v483_v46 = vpop.permute.xlu1 %482 }
 0x698   :  { %v485_v47 = vmul.f32 %v483_v46, %v466_v19  ;;  %v759_v46 = vld [vmem:[#allocation3 + $0x3] sm:$0x1] }
 0x69a   :  { %487 = vrot.lane.b32.xlu0 %v485_v47, %s1704_s11 }
 0x704   :  { %v551_v48 = vpop.permute.xlu0 %550 }
 0x705   :  { %v1872_v49 = vmul.f32 %v551_v48, %v534_v35 }
 0x707   :  { %626 = vrot.lane.b32.xlu2 %v1872_v49, %s1704_s11 }
 0x70c   :  { %v488_v50 = vpop.permute.xlu0 %487 }
 0x70d   :  { %490 = vst.msk [vmem:[#allocation4 + $0x2] sm:$0x1] %vm224_vm10, %v488_v50  ;;  %1354 = vmatmul.msk.f32.vlgmr.msra.gmra.mxu1 %vm158_vm11, %v488_v50 }
 0x70e   :  { %1112 = vmatpush.msra.mxu1 %v1772_v2  ;;  %v625_v2 = vld [vmem:[#allocation3 + $0x4] sm:$0x1] }
 0x710   :  { %1113 = vmatpush.msra.mxu1 %v1774_v3 }
 0x761   :  { %v627_v51 = vpop.permute.xlu2 %626 }
 0x762   :  { %1356 = vmatmul.msk.f32.vlgmr.msra.gmra.mxu2 %vm158_vm11, %v627_v51 }
 0x763   :  { %1180 = vmatpush.msra.mxu2 %v1776_v4 }
 0x765   :  { %1181 = vmatpush.msra.mxu2 %v1779_v6 }
 0x78a   :  { %v579_v53 = vpop.f32.mrf.mxu1 }
 0x78b   :  { %v582_v43 = vadd.f32 %v579_v53, %v559_v52 }
 0x78d   :  { %1453 = vtanh.f32 %v582_v43  ;;  %v1355_v56 = vmul.f32 -1.442695, %v582_v43 }
 0x78f   :  { %1455 = vpow2.f32 %v1355_v56 }
 0x793   :  { %v1454_v54 = vpop.eup %1453 }
 0x794   :  { %605 = vrot.lane.b32.xlu1 %v1454_v54, %s1701_s9 }
 0x795   :  { %v1456_v57 = vpop.eup %1455 }
 0x796   :  { %v586_v3 = vadd.f32 1.0, %v1456_v57 }
 0x798   :  { %v598_v1 = vand.u32 2147483648, %v586_v3  ;;  %vm592_vm1 = vweird.f32 %v586_v3  ;;  %v596_v5 = vand.u32 2147483647, %v586_v3 }
 0x79a   :  { %v599_v8 = vor.u32 1.1754944e-38, %v598_v1  ;;  %vm597_vm3 = vcmp.eq.f32.partialorder %v596_v5, 8.507059e+37 }
 0x7e5   :  { %v647_v58 = vpop.f32.mrf.mxu2 }
 0x7e6   :  { %v650_v59 = vadd.f32 %v647_v58, %v625_v2 }
 0x7e8   :  { %1457 = vtanh.f32 %v650_v59  ;;  %v1357_v12 = vmul.f32 -1.442695, %v650_v59 }
 0x7e9   :  { %1459 = vrcp.f32 %v586_v3 }
 0x7ea   :  { %1461 = vpow2.f32 %v1357_v12 }
 0x7ee   :  { %v1458_v60 = vpop.eup %1457 }
 0x7ef   :  { %673 = vrot.lane.b32.xlu2 %v1458_v60, %s1701_s9  ;;  %v1460_v4 = vpop.eup %1459 }
 0x7f0   :  { %v588_v6 = vmul.f32 %v1460_v4, %v586_v3  ;;  %vm593_vm15 = vweird.f32 %v1460_v4  ;;  %v1462_v13 = vpop.eup %1461 }
 0x7f1   :  { %vm594_vm2 = vmor %vm592_vm1, %vm593_vm15  ;;  %v654_v14 = vadd.f32 1.0, %v1462_v13 }
 0x7f2   :  { %v589_v61 = vsub.f32 1.0, %v588_v6 }
 0x7f3   :  { %1463 = vrcp.f32 %v654_v14  ;;  %v666_v20 = vand.u32 2147483648, %v654_v14  ;;  %vm660_vm5 = vweird.f32 %v654_v14  ;;  %v664_v21 = vand.u32 2147483647, %v654_v14 }
 0x7f4   :  { %v590_v62 = vmul.f32 %v1460_v4, %v589_v61 }
 0x7f5   :  { %v667_v23 = vor.u32 1.1754944e-38, %v666_v20  ;;  %vm665_vm7 = vcmp.eq.f32.partialorder %v664_v21, 8.507059e+37 }
 0x7f6   :  { %v591_v0 = vadd.f32 %v1460_v4, %v590_v62 }
 0x7f8   :  { %v595_v7 = vsel %vm594_vm2, %v1460_v4, %v591_v0 }
 0x7f9   :  { %v600_v10 = vsel %vm597_vm3, %v599_v8, %v595_v7  ;;  %v1464_v15 = vpop.eup %1463 }
 0x7fa   :  { %v656_v16 = vmul.f32 %v1464_v15, %v654_v14  ;;  %vm661_vm4 = vweird.f32 %v1464_v15  ;;  %v603_v27 = vmul.f32 %v600_v10, %v1862_v39 }
 0x7fb   :  { %vm662_vm6 = vmor %vm660_vm5, %vm661_vm4 }
 0x7fc   :  { %v657_v17 = vsub.f32 1.0, %v656_v16 }
 0x7fe   :  { %v658_v18 = vmul.f32 %v1464_v15, %v657_v17 }
 0x800   :  { %v659_v19 = vadd.f32 %v1464_v15, %v658_v18 }
 0x802   :  { %v663_v22 = vsel %vm662_vm6, %v1464_v15, %v659_v19 }
 0x803   :  { %v668_v25 = vsel %vm665_vm7, %v667_v23, %v663_v22 }
 0x804   :  { %v671_v31 = vmul.f32 %v668_v25, %v1867_v44 }
 0x806   :  { %v606_v9 = vpop.permute.xlu1 %605 }
 0x807   :  { %v608_v11 = vmul.f32 %v606_v9, %v600_v10 }
 0x809   :  { %610 = vrot.lane.b32.xlu0 %v608_v11, %s1702_s2 }
 0x849   :  { %v674_v24 = vpop.permute.xlu2 %673 }
 0x84a   :  { %v676_v26 = vmul.f32 %v674_v24, %v668_v25 }
 0x84c   :  { %678 = vrot.lane.b32.xlu1 %v676_v26, %s1702_s2 }
 0x87b   :  { %v611_v28 = vpop.permute.xlu0 %610 }
 0x87c   :  { %v1888_v29 = vadd.f32 %v611_v28, %v603_v27 }
 0x87e   :  { %1465 = vtanh.f32 %v1888_v29 }
 0x884   :  { %v1466_v30 = vpop.eup %1465 }
 0x885   :  { %616 = vrot.lane.b32.xlu2 %v1466_v30, %s1703_s10 }
 0x8be   :  { %v679_v32 = vpop.permute.xlu1 %678 }
 0x8bf   :  { %v1893_v33 = vadd.f32 %v679_v32, %v671_v31  ;;  %v827_v32 = vld [vmem:[#allocation2 + $0x5] sm:$0x1] }
 0x8c1   :  { %1467 = vtanh.f32 %v1893_v33 }
 0x8c7   :  { %v1468_v34 = vpop.eup %1467 }
 0x8c8   :  { %684 = vrot.lane.b32.xlu0 %v1468_v34, %s1703_s10 }
 0x8df   :  { %v617_v35 = vpop.permute.xlu2 %616 }
 0x8e0   :  { %v619_v36 = vmul.f32 %v617_v35, %v600_v10 }
 0x8e2   :  { %621 = vrot.lane.b32.xlu1 %v619_v36, %s1704_s11 }
 0x93a   :  { %v685_v37 = vpop.permute.xlu0 %684 }
 0x93b   :  { %v1898_v38 = vmul.f32 %v685_v37, %v668_v25 }
 0x93d   :  { %760 = vrot.lane.b32.xlu2 %v1898_v38, %s1704_s11 }
 0x954   :  { %v622_v39 = vpop.permute.xlu1 %621 }
 0x955   :  { %624 = vst.msk [vmem:[#allocation4 + $0x3] sm:$0x1] %vm224_vm10, %v622_v39  ;;  %1358 = vmatmul.msk.f32.vlgmr.msrb.gmra.mxu3 %vm158_vm11, %v622_v39  ;;  %v893_v39 = vld [vmem:[#allocation3 + $0x2] sm:$0x1] }
 0x997   :  { %v761_v40 = vpop.permute.xlu2 %760 }
 0x998   :  { %1360 = vmatmul.msk.f32.vlgmr.msra.gmra.mxu0 %vm158_vm11, %v761_v40 }
 0x9d8   :  { %v713_v42 = vpop.f32.mrf.mxu3 }
 0x9d9   :  { %v716_v44 = vadd.f32 %v713_v42, %v693_v41 }
 0x9db   :  { %1469 = vtanh.f32 %v716_v44  ;;  %v1359_v51 = vmul.f32 -1.442695, %v716_v44 }
 0x9e1   :  { %v1470_v45 = vpop.eup %1469 }
 0x9e2   :  { %739 = vrot.lane.b32.xlu1 %v1470_v45, %s1701_s9 }
 0xa15   :  { %v781_v47 = vpop.f32.mrf.mxu0 }
 0xa16   :  { %v784_v48 = vadd.f32 %v781_v47, %v759_v46 }
 0xa18   :  { %1471 = vtanh.f32 %v784_v48  ;;  %v1361_v62 = vmul.f32 -1.442695, %v784_v48 }
 0xa19   :  { %1473 = vpow2.f32 %v1359_v51 }
 0xa1e   :  { %v1472_v50 = vpop.eup %1471 }
 0xa1f   :  { %807 = vrot.lane.b32.xlu0 %v1472_v50, %s1701_s9  ;;  %v1474_v52 = vpop.eup %1473 }
 0xa20   :  { %v720_v53 = vadd.f32 1.0, %v1474_v52 }
 0xa22   :  { %1475 = vrcp.f32 %v720_v53  ;;  %v732_v58 = vand.u32 2147483648, %v720_v53  ;;  %vm726_vm9 = vweird.f32 %v720_v53  ;;  %v730_v3 = vand.u32 2147483647, %v720_v53 }
 0xa23   :  { %1477 = vpow2.f32 %v1361_v62 }
 0xa24   :  { %v733_v60 = vor.u32 1.1754944e-38, %v732_v58  ;;  %vm731_vm13 = vcmp.eq.f32.partialorder %v730_v3, 8.507059e+37 }
 0xa28   :  { %v1476_v43 = vpop.eup %1475 }
 0xa29   :  { %v722_v54 = vmul.f32 %v1476_v43, %v720_v53  ;;  %vm727_vm8 = vweird.f32 %v1476_v43  ;;  %v1478_v0 = vpop.eup %1477 }
 0xa2a   :  { %vm728_vm12 = vmor %vm726_vm9, %vm727_vm8  ;;  %v788_v1 = vadd.f32 1.0, %v1478_v0 }
 0xa2b   :  { %v723_v56 = vsub.f32 1.0, %v722_v54 }
 0xa2c   :  { %1479 = vrcp.f32 %v788_v1  ;;  %v800_v11 = vand.u32 2147483648, %v788_v1  ;;  %vm794_vm15 = vweird.f32 %v788_v1  ;;  %v798_v12 = vand.u32 2147483647, %v788_v1 }
 0xa2d   :  { %v724_v57 = vmul.f32 %v1476_v43, %v723_v56 }
 0xa2e   :  { %v801_v14 = vor.u32 1.1754944e-38, %v800_v11  ;;  %vm799_vm2 = vcmp.eq.f32.partialorder %v798_v12, 8.507059e+37 }
 0xa2f   :  { %v725_v2 = vadd.f32 %v1476_v43, %v724_v57 }
 0xa31   :  { %v729_v59 = vsel %vm728_vm12, %v1476_v43, %v725_v2 }
 0xa32   :  { %v734_v6 = vsel %vm731_vm13, %v733_v60, %v729_v59  ;;  %v1480_v5 = vpop.eup %1479 }
 0xa33   :  { %v790_v7 = vmul.f32 %v1480_v5, %v788_v1  ;;  %vm795_vm14 = vweird.f32 %v1480_v5  ;;  %v737_v18 = vmul.f32 %v734_v6, %v1888_v29 }
 0xa34   :  { %vm796_vm1 = vmor %vm794_vm15, %vm795_vm14 }
 0xa35   :  { %v791_v8 = vsub.f32 1.0, %v790_v7 }
 0xa37   :  { %v792_v9 = vmul.f32 %v1480_v5, %v791_v8 }
 0xa39   :  { %v793_v10 = vadd.f32 %v1480_v5, %v792_v9 }
 0xa3b   :  { %v797_v13 = vsel %vm796_vm1, %v1480_v5, %v793_v10 }
 0xa3c   :  { %v802_v16 = vsel %vm799_vm2, %v801_v14, %v797_v13 }
 0xa3d   :  { %v805_v22 = vmul.f32 %v802_v16, %v1893_v33 }
 0xa54   :  { %v740_v4 = vpop.permute.xlu1 %739 }
 0xa55   :  { %v742_v61 = vmul.f32 %v740_v4, %v734_v6 }
 0xa57   :  { %744 = vrot.lane.b32.xlu0 %v742_v61, %s1702_s2 }
 0xa91   :  { %v808_v15 = vpop.permute.xlu0 %807 }
 0xa92   :  { %v810_v17 = vmul.f32 %v808_v15, %v802_v16 }
 0xa94   :  { %812 = vrot.lane.b32.xlu2 %v810_v17, %s1702_s2 }
 0xac9   :  { %v745_v19 = vpop.permute.xlu0 %744 }
 0xaca   :  { %v1910_v20 = vadd.f32 %v745_v19, %v737_v18 }
 0xacc   :  { %1481 = vtanh.f32 %v1910_v20 }
 0xad2   :  { %v1482_v21 = vpop.eup %1481 }
 0xad3   :  { %750 = vrot.lane.b32.xlu2 %v1482_v21, %s1703_s10 }
 0xaee   :  { %v813_v23 = vpop.permute.xlu2 %812 }
 0xaef   :  { %v1915_v24 = vadd.f32 %v813_v23, %v805_v22 }
 0xaf1   :  { %1483 = vtanh.f32 %v1915_v24 }
 0xaf7   :  { %v1484_v25 = vpop.eup %1483 }
 0xaf8   :  { %818 = vrot.lane.b32.xlu1 %v1484_v25, %s1703_s10 }
 0xb2d   :  { %v751_v26 = vpop.permute.xlu2 %750 }
 0xb2e   :  { %v753_v27 = vmul.f32 %v751_v26, %v734_v6 }
 0xb30   :  { %755 = vrot.lane.b32.xlu1 %v753_v27, %s1704_s11 }
 0xb6a   :  { %v819_v28 = vpop.permute.xlu1 %818 }
 0xb6b   :  { %v1920_v29 = vmul.f32 %v819_v28, %v802_v16 }
 0xb6d   :  { %894 = vrot.lane.b32.xlu0 %v1920_v29, %s1704_s11 }
 0xba2   :  { %v1924_v30 = vpop.permute.xlu1 %755 }
 0xba3   :  { %1362 = vmatmul.msk.f32.vlgmr.msrb.gmra.mxu1 %vm158_vm11, %v1924_v30 }
 0xbdf   :  { %v895_v31 = vpop.permute.xlu0 %894 }
 0xbe0   :  { %1364 = vmatmul.msk.f32.vlgmr.msrb.gmra.mxu2 %vm158_vm11, %v895_v31 }
 0xc20   :  { %v847_v33 = vpop.f32.mrf.mxu1 }
 0xc21   :  { %v850_v34 = vadd.f32 %v847_v33, %v827_v32 }
 0xc23   :  { %1485 = vtanh.f32 %v850_v34  ;;  %v1363_v36 = vmul.f32 -1.442695, %v850_v34 }
 0xc25   :  { %1487 = vpow2.f32 %v1363_v36 }
 0xc29   :  { %v1486_v35 = vpop.eup %1485 }
 0xc2a   :  { %873 = vrot.lane.b32.xlu2 %v1486_v35, %s1701_s9  ;;  %v1027_v35 = vld [vmem:[#allocation3 + $0x1] sm:$0x1] }
 0xc2b   :  { %v1488_v37 = vpop.eup %1487 }
 0xc2c   :  { %v854_v41 = vadd.f32 1.0, %v1488_v37 }
 0xc2e   :  { %v866_v51 = vand.u32 2147483648, %v854_v41  ;;  %vm860_vm4 = vweird.f32 %v854_v41  ;;  %v864_v52 = vand.u32 2147483647, %v854_v41 }
 0xc30   :  { %v867_v43 = vor.u32 1.1754944e-38, %v866_v51  ;;  %vm865_vm6 = vcmp.eq.f32.partialorder %v864_v52, 8.507059e+37 }
 0xc63   :  { %v915_v40 = vpop.f32.mrf.mxu2 }
 0xc64   :  { %v918_v42 = vadd.f32 %v915_v40, %v893_v39 }
 0xc66   :  { %1489 = vtanh.f32 %v918_v42  ;;  %v1365_v2 = vmul.f32 -1.442695, %v918_v42 }
 0xc67   :  { %1491 = vrcp.f32 %v854_v41 }
 0xc68   :  { %1493 = vpow2.f32 %v1365_v2 }
 0xc6c   :  { %v1490_v44 = vpop.eup %1489 }
 0xc6d   :  { %941 = vrot.lane.b32.xlu0 %v1490_v44, %s1701_s9  ;;  %v1492_v45 = vpop.eup %1491 }
 0xc6e   :  { %v856_v46 = vmul.f32 %v1492_v45, %v854_v41  ;;  %vm861_vm3 = vweird.f32 %v1492_v45  ;;  %v1494_v58 = vpop.eup %1493 }
 0xc6f   :  { %vm862_vm5 = vmor %vm860_vm4, %vm861_vm3  ;;  %v922_v3 = vadd.f32 1.0, %v1494_v58 }
 0xc70   :  { %v857_v47 = vsub.f32 1.0, %v856_v46 }
 0xc71   :  { %1495 = vrcp.f32 %v922_v3  ;;  %v934_v62 = vand.u32 2147483648, %v922_v3  ;;  %vm928_vm8 = vweird.f32 %v922_v3  ;;  %v932_v0 = vand.u32 2147483647, %v922_v3 }
 0xc72   :  { %v858_v48 = vmul.f32 %v1492_v45, %v857_v47 }
 0xc73   :  { %v935_v5 = vor.u32 1.1754944e-38, %v934_v62  ;;  %vm933_vm12 = vcmp.eq.f32.partialorder %v932_v0, 8.507059e+37 }
 0xc74   :  { %v859_v50 = vadd.f32 %v1492_v45, %v858_v48 }
 0xc76   :  { %v863_v53 = vsel %vm862_vm5, %v1492_v45, %v859_v50 }
 0xc77   :  { %v868_v56 = vsel %vm865_vm6, %v867_v43, %v863_v53  ;;  %v1496_v59 = vpop.eup %1495 }
 0xc78   :  { %v924_v60 = vmul.f32 %v1496_v59, %v922_v3  ;;  %vm929_vm7 = vweird.f32 %v1496_v59  ;;  %v871_v10 = vmul.f32 %v868_v56, %v1910_v20 }
 0xc79   :  { %vm930_vm9 = vmor %vm928_vm8, %vm929_vm7 }
 0xc7a   :  { %v925_v4 = vsub.f32 1.0, %v924_v60 }
 0xc7c   :  { %v926_v6 = vmul.f32 %v1496_v59, %v925_v4 }
 0xc7e   :  { %v927_v61 = vadd.f32 %v1496_v59, %v926_v6 }
 0xc80   :  { %v931_v1 = vsel %vm930_vm9, %v1496_v59, %v927_v61 }
 0xc81   :  { %v936_v8 = vsel %vm933_vm12, %v935_v5, %v931_v1 }
 0xc82   :  { %v939_v14 = vmul.f32 %v936_v8, %v1915_v24  ;;  %v961_v24 = vld [vmem:[#allocation2 + $0x6] sm:$0x1] }
 0xc84   :  { %v874_v54 = vpop.permute.xlu2 %873 }
 0xc85   :  { %v876_v57 = vmul.f32 %v874_v54, %v868_v56 }
 0xc87   :  { %878 = vrot.lane.b32.xlu1 %v876_v57, %s1702_s2 }
 0xcdf   :  { %v942_v7 = vpop.permute.xlu0 %941 }
 0xce0   :  { %v944_v9 = vmul.f32 %v942_v7, %v936_v8 }
 0xce2   :  { %946 = vrot.lane.b32.xlu2 %v944_v9, %s1702_s2 }
 0xcf9   :  { %v879_v11 = vpop.permute.xlu1 %878 }
 0xcfa   :  { %v1934_v12 = vadd.f32 %v879_v11, %v871_v10 }
 0xcfc   :  { %1497 = vtanh.f32 %v1934_v12 }
 0xd02   :  { %v1498_v13 = vpop.eup %1497 }
 0xd03   :  { %884 = vrot.lane.b32.xlu0 %v1498_v13, %s1703_s10 }
 0xd3c   :  { %v947_v15 = vpop.permute.xlu2 %946 }
 0xd3d   :  { %v1939_v16 = vadd.f32 %v947_v15, %v939_v14 }
 0xd3f   :  { %1499 = vtanh.f32 %v1939_v16 }
 0xd45   :  { %v1500_v17 = vpop.eup %1499 }
 0xd46   :  { %952 = vrot.lane.b32.xlu1 %v1500_v17, %s1703_s10 }
 0xd75   :  { %v885_v18 = vpop.permute.xlu0 %884 }
 0xd76   :  { %v887_v19 = vmul.f32 %v885_v18, %v868_v56  ;;  %v1095_v18 = vld [vmem:[#allocation2 + $0x7] sm:$0x1] }
 0xd78   :  { %889 = vrot.lane.b32.xlu2 %v887_v19, %s1704_s11 }
 0xdb8   :  { %v953_v20 = vpop.permute.xlu1 %952 }
 0xdb9   :  { %v1944_v21 = vmul.f32 %v953_v20, %v936_v8 }
 0xdbb   :  { %1028 = vrot.lane.b32.xlu0 %v1944_v21, %s1704_s11 }
 0xdd2   :  { %v1948_v22 = vpop.permute.xlu2 %889 }
 0xdd3   :  { %1366 = vmatmul.msk.f32.vlgmr.msra.gmra.mxu3 %vm158_vm11, %v1948_v22 }
 0xe2d   :  { %v1029_v23 = vpop.permute.xlu0 %1028 }
 0xe2e   :  { %1368 = vmatmul.msk.f32.vlgmr.msrb.gmra.mxu0 %vm158_vm11, %v1029_v23 }
 0xe56   :  { %v981_v25 = vpop.f32.mrf.mxu3 }
 0xe57   :  { %v984_v26 = vadd.f32 %v981_v25, %v961_v24 }
 0xe59   :  { %1501 = vtanh.f32 %v984_v26  ;;  %v1367_v28 = vmul.f32 -1.442695, %v984_v26 }
 0xe5b   :  { %1503 = vpow2.f32 %v1367_v28 }
 0xe5f   :  { %v1502_v27 = vpop.eup %1501 }
 0xe60   :  { %1007 = vrot.lane.b32.xlu2 %v1502_v27, %s1701_s9 }
 0xe61   :  { %v1504_v31 = vpop.eup %1503 }
 0xe62   :  { %v988_v32 = vadd.f32 1.0, %v1504_v31 }
 0xe64   :  { %1505 = vrcp.f32 %v988_v32  ;;  %v1000_v44 = vand.u32 2147483648, %v988_v32  ;;  %vm994_vm14 = vweird.f32 %v988_v32  ;;  %v998_v45 = vand.u32 2147483647, %v988_v32 }
 0xe66   :  { %v1001_v47 = vor.u32 1.1754944e-38, %v1000_v44  ;;  %vm999_vm1 = vcmp.eq.f32.partialorder %v998_v45, 8.507059e+37 }
 0xe6a   :  { %v1506_v33 = vpop.eup %1505 }
 0xe6b   :  { %v990_v34 = vmul.f32 %v1506_v33, %v988_v32  ;;  %vm995_vm13 = vweird.f32 %v1506_v33 }
 0xe6c   :  { %vm996_vm15 = vmor %vm994_vm14, %vm995_vm13 }
 0xe6d   :  { %v991_v37 = vsub.f32 1.0, %v990_v34 }
 0xe6f   :  { %v992_v40 = vmul.f32 %v1506_v33, %v991_v37 }
 0xe71   :  { %v993_v41 = vadd.f32 %v1506_v33, %v992_v40 }
 0xe73   :  { %v997_v46 = vsel %vm996_vm15, %v1506_v33, %v993_v41  ;;  %v1161_v33 = vld [vmem:[#allocation3] sm:$0x1]  ;;  %vm289_vm15 = vcmask 254080  }
 0xe74   :  { %v1002_v50 = vsel %vm999_vm1, %v1001_v47, %v997_v46 }
 0xe75   :  { %v1005_v0 = vmul.f32 %v1002_v50, %v1934_v12 }
 0xeab   :  { %v1049_v36 = vpop.f32.mrf.mxu0 }
 0xeac   :  { %v1052_v39 = vadd.f32 %v1049_v36, %v1027_v35 }
 0xeae   :  { %1507 = vtanh.f32 %v1052_v39  ;;  %v1369_v52 = vmul.f32 -1.442695, %v1052_v39 }
 0xeb0   :  { %1509 = vpow2.f32 %v1369_v52 }
 0xeb4   :  { %v1508_v42 = vpop.eup %1507 }
 0xeb5   :  { %1075 = vrot.lane.b32.xlu1 %v1508_v42, %s1701_s9 }
 0xeb6   :  { %v1510_v53 = vpop.eup %1509 }
 0xeb7   :  { %v1056_v43 = vadd.f32 1.0, %v1510_v53 }
 0xeb9   :  { %1511 = vrcp.f32 %v1056_v43  ;;  %v1068_v3 = vand.u32 2147483648, %v1056_v43  ;;  %vm1062_vm3 = vweird.f32 %v1056_v43  ;;  %v1066_v59 = vand.u32 2147483647, %v1056_v43 }
 0xeba   :  { %v1008_v48 = vpop.permute.xlu2 %1007 }
 0xebb   :  { %v1010_v51 = vmul.f32 %v1008_v48, %v1002_v50  ;;  %v1069_v4 = vor.u32 1.1754944e-38, %v1068_v3  ;;  %vm1067_vm5 = vcmp.eq.f32.partialorder %v1066_v59, 8.507059e+37 }
 0xebd   :  { %1012 = vrot.lane.b32.xlu1 %v1010_v51, %s1702_s2 }
 0xebf   :  { %v1512_v54 = vpop.eup %1511 }
 0xec0   :  { %v1058_v56 = vmul.f32 %v1512_v54, %v1056_v43  ;;  %vm1063_vm2 = vweird.f32 %v1512_v54 }
 0xec1   :  { %vm1064_vm4 = vmor %vm1062_vm3, %vm1063_vm2 }
 0xec2   :  { %v1059_v57 = vsub.f32 1.0, %v1058_v56 }
 0xec4   :  { %v1060_v2 = vmul.f32 %v1512_v54, %v1059_v57 }
 0xec6   :  { %v1061_v58 = vadd.f32 %v1512_v54, %v1060_v2 }
 0xec8   :  { %v1065_v60 = vsel %vm1064_vm4, %v1512_v54, %v1061_v58  ;;  %vm1314_vm4 = vcmask 253952  }
 0xec9   :  { %v1070_v61 = vsel %vm1067_vm5, %v1069_v4, %v1065_v60 }
 0xeca   :  { %v1073_v8 = vmul.f32 %v1070_v61, %v1939_v16 }
 0xf27   :  { %v1076_v6 = vpop.permute.xlu1 %1075 }
 0xf28   :  { %v1078_v62 = vmul.f32 %v1076_v6, %v1070_v61 }
 0xf2a   :  { %1080 = vrot.lane.b32.xlu0 %v1078_v62, %s1702_s2 }
 0xf2f   :  { %v1013_v1 = vpop.permute.xlu1 %1012 }
 0xf30   :  { %v1015_v5 = vadd.f32 %v1013_v1, %v1005_v0 }
 0xf32   :  { %1513 = vtanh.f32 %v1015_v5 }
 0xf38   :  { %v1514_v7 = vpop.eup %1513 }
 0xf39   :  { %1018 = vrot.lane.b32.xlu0 %v1514_v7, %s1703_s10 }
 0xf9c   :  { %v1081_v9 = vpop.permute.xlu0 %1080 }
 0xf9d   :  { %v1960_v10 = vadd.f32 %v1081_v9, %v1073_v8 }
 0xf9f   :  { %1515 = vtanh.f32 %v1960_v10 }
 0xfa5   :  { %v1516_v11 = vpop.eup %1515 }
 0xfa6   :  { %1086 = vrot.lane.b32.xlu2 %v1516_v11, %s1703_s10 }
 0xfab   :  { %v1019_v13 = vpop.permute.xlu0 %1018 }
 0xfac   :  { %v1021_v14 = vmul.f32 %v1019_v13, %v1002_v50 }
 0xfae   :  { %1023 = vrot.lane.b32.xlu2 %v1021_v14, %s1704_s11 }
0x1000   :  { %v1087_v12 = vpop.permute.xlu2 %1086 }
0x1001   :  { %v1965_v15 = vmul.f32 %v1087_v12, %v1070_v61 }
0x1003   :  { %1162 = vrot.lane.b32.xlu1 %v1965_v15, %s1704_s11 }
0x1008   :  { %v1969_v17 = vpop.permute.xlu2 %1023 }
0x1009   :  { %1370 = vmatmul.msk.f32.vlgmr.msra.gmra.mxu1 %vm158_vm11, %v1969_v17 }
0x1075   :  { %v1163_v16 = vpop.permute.xlu1 %1162 }
0x1076   :  { %1372 = vmatmul.msk.f32.vlgmr.msra.gmra.mxu2 %vm158_vm11, %v1163_v16 }
0x1086   :  { %v1115_v19 = vpop.f32.mrf.mxu1 }
0x1087   :  { %v1118_v20 = vadd.f32 %v1115_v19, %v1095_v18  ;;  %v1403_v18 = vld [vmem:[%s2030_s6] ss:$0 sm:$0xff]  ;;  %s1705_s6 = smov [#allocation14]  }
0x1089   :  { %1517 = vtanh.f32 %v1118_v20  ;;  %v1371_v24 = vmul.f32 -1.442695, %v1118_v20  ;;  %v1404_v20 = vld [vmem:[%s2031_s7] ss:$0 sm:$0xff]  ;;  %s1321_s7 = sshll.u32 %s1705_s6, 4  ;;  %s1322_s7 = int_to_ptr.vmem [resolvable:$true] %s1321_s7 }
0x108b   :  { %1519 = vpow2.f32 %v1371_v24 }
0x108f   :  { %v1518_v23 = vpop.eup %1517 }
0x1090   :  { %1141 = vrot.lane.b32.xlu0 %v1518_v23, %s1701_s9 }
0x1091   :  { %v1520_v25 = vpop.eup %1519 }
0x1092   :  { %v1122_v26 = vadd.f32 1.0, %v1520_v25 }
0x1094   :  { %1521 = vrcp.f32 %v1122_v26  ;;  %v1134_v37 = vand.u32 2147483648, %v1122_v26  ;;  %vm1128_vm6 = vweird.f32 %v1122_v26  ;;  %v1132_v39 = vand.u32 2147483647, %v1122_v26 }
0x1096   :  { %v1135_v41 = vor.u32 1.1754944e-38, %v1134_v37  ;;  %vm1133_vm8 = vcmp.eq.f32.partialorder %v1132_v39, 8.507059e+37 }
0x109a   :  { %v1522_v27 = vpop.eup %1521 }
0x109b   :  { %v1124_v28 = vmul.f32 %v1522_v27, %v1122_v26  ;;  %vm1129_vm11 = vweird.f32 %v1522_v27 }
0x109c   :  { %vm1130_vm7 = vmor %vm1128_vm6, %vm1129_vm11 }
0x109d   :  { %v1125_v31 = vsub.f32 1.0, %v1124_v28 }
0x109f   :  { %v1126_v32 = vmul.f32 %v1522_v27, %v1125_v31 }
0x10a1   :  { %v1127_v36 = vadd.f32 %v1522_v27, %v1126_v32 }
0x10a3   :  { %v1131_v40 = vsel %vm1130_vm7, %v1522_v27, %v1127_v36 }
0x10a4   :  { %v1136_v45 = vsel %vm1133_vm8, %v1135_v41, %v1131_v40 }
0x10a5   :  { %v1139_v51 = vmul.f32 %v1136_v45, %v1015_v5 }
0x10f9   :  { %v1183_v34 = vpop.f32.mrf.mxu2 }
0x10fa   :  { %v1186_v35 = vadd.f32 %v1183_v34, %v1161_v33 }
0x10fc   :  { %1523 = vtanh.f32 %v1186_v35  ;;  %v1373_v47 = vmul.f32 -1.442695, %v1186_v35 }
0x10fe   :  { %1525 = vpow2.f32 %v1373_v47 }
0x1102   :  { %v1524_v42 = vpop.eup %1523  ;;  %v1142_v44 = vpop.permute.xlu0 %1141 }
0x1103   :  { %v1144_v46 = vmul.f32 %v1142_v44, %v1136_v45  ;;  %1209 = vrot.lane.b32.xlu1 %v1524_v42, %s1701_s9 }
0x1104   :  { %v1526_v48 = vpop.eup %1525 }
0x1105   :  { %1146 = vrot.lane.b32.xlu2 %v1144_v46, %s1702_s2  ;;  %v1190_v50 = vadd.f32 1.0, %v1526_v48 }
0x1107   :  { %1527 = vrcp.f32 %v1190_v50  ;;  %v1202_v3 = vand.u32 2147483648, %v1190_v50  ;;  %vm1196_vm12 = vweird.f32 %v1190_v50  ;;  %v1200_v59 = vand.u32 2147483647, %v1190_v50 }
0x1109   :  { %v1203_v4 = vor.u32 1.1754944e-38, %v1202_v3  ;;  %vm1201_vm14 = vcmp.eq.f32.partialorder %v1200_v59, 8.507059e+37 }
0x110d   :  { %v1528_v52 = vpop.eup %1527 }
0x110e   :  { %v1192_v54 = vmul.f32 %v1528_v52, %v1190_v50  ;;  %vm1197_vm9 = vweird.f32 %v1528_v52 }
0x110f   :  { %vm1198_vm13 = vmor %vm1196_vm12, %vm1197_vm9 }
0x1110   :  { %v1193_v56 = vsub.f32 1.0, %v1192_v54 }
0x1112   :  { %v1194_v2 = vmul.f32 %v1528_v52, %v1193_v56 }
0x1114   :  { %v1195_v58 = vadd.f32 %v1528_v52, %v1194_v2 }
0x1116   :  { %v1199_v60 = vsel %vm1198_vm13, %v1528_v52, %v1195_v58 }
0x1117   :  { %v1204_v61 = vsel %vm1201_vm14, %v1203_v4, %v1199_v60 }
0x115f   :  { %v1147_v53 = vpop.permute.xlu2 %1146 }
0x1160   :  { %v1149_v43 = vadd.f32 %v1147_v53, %v1139_v51 }
0x1162   :  { %1529 = vtanh.f32 %v1149_v43 }
0x1168   :  { %v1530_v57 = vpop.eup %1529 }
0x1169   :  { %1152 = vrot.lane.b32.xlu1 %v1530_v57, %s1703_s10 }
0x1171   :  { %421 = vrot.lane.b32.xlu1 %v1846_v55, %s1701_s9 }
0x1175   :  { %v1210_v6 = vpop.permute.xlu1 %1209 }
0x1176   :  { %v1212_v62 = vmul.f32 %v1210_v6, %v1204_v61 }
0x1178   :  { %1214 = vrot.lane.b32.xlu0 %v1212_v62, %s1702_s2 }
0x1179   :  { %823 = vrot.lane.b32.xlu1 %v1920_v29, %s1701_s9  ;;  %v1207_v29 = vmul.f32 %v1204_v61, %v1960_v10 }
0x1180   :  { %286 = vrot.lane.b32.xlu0 %v1820_v63, %s1701_s9 }
0x1188   :  { %689 = vrot.lane.b32.xlu0 %v1898_v38, %s1701_s9 }
0x1190   :  { %1091 = vrot.lane.b32.xlu0 %v1965_v15, %s1701_s9  ;;  %v1385_v15 = vld [vmem:[#allocation13] sm:$0xff] }
0x11db   :  { %v1153_v55 = vpop.permute.xlu1 %1152 }
0x11dc   :  { %v1155_v0 = vmul.f32 %v1153_v55, %v1136_v45 }
0x11de   :  { %1157 = vrot.lane.b32.xlu1 %v1155_v0, %s1704_s11 }
0x11e3   :  { %v422_v1 = vpop.permute.xlu1 %421 }
0x11e4   :  { %424 = vst.msk [vmem:[#allocation4 + $0x6] sm:$0x1] %vm289_vm15, %v422_v1 }
0x11e5   :  { %1026 = vst.msk [vmem:[#allocation4 + $0x6] sm:$0x1] %vm224_vm10, %v1969_v17 }
0x11ea   :  { %v1215_v63 = vpop.permute.xlu0 %1214 }
0x11eb   :  { %v1217_v5 = vadd.f32 %v1215_v63, %v1207_v29  ;;  %v824_v7 = vpop.permute.xlu1 %823 }
0x11ec   :  { %826 = vst.msk [vmem:[#allocation4 + $0x3] sm:$0x1] %vm289_vm15, %v824_v7 }
0x11ed   :  { %1531 = vtanh.f32 %v1217_v5 }
0x11f2   :  { %v287_v38 = vpop.permute.xlu0 %286 }
0x11f3   :  { %v1532_v8 = vpop.eup %1531  ;;  %290 = vst.msk [vmem:[#allocation4 + $0x7] sm:$0x1] %vm289_vm15, %v287_v38 }
0x11f4   :  { %1220 = vrot.lane.b32.xlu2 %v1532_v8, %s1703_s10 }
0x11fa   :  { %v690_v9 = vpop.permute.xlu0 %689 }
0x11fb   :  { %692 = vst.msk [vmem:[#allocation4 + $0x4] sm:$0x1] %vm289_vm15, %v690_v9 }
0x11fc   :  { %758 = vst.msk [vmem:[#allocation4 + $0x4] sm:$0x1] %vm224_vm10, %v1924_v30  ;;  %555 = vrot.lane.b32.xlu2 %v1872_v49, %s1701_s9  ;;  %v1386_v30 = vld [vmem:[#allocation13 + $0x8] sm:$0xff] }
0x11fd   :  { %1260 = vmatpush.bf16.msrb.mxu3 %v1386_v30 }
0x1201   :  { %1261 = vmatpush.bf16.msrb.mxu3 %v1385_v15 }
0x1202   :  { %v1092_v10 = vpop.permute.xlu0 %1091 }
0x1203   :  { %1094 = vst.msk [vmem:[#allocation4 + $0x1] sm:$0x1] %vm289_vm15, %v1092_v10 }
0x1204   :  { %957 = vrot.lane.b32.xlu2 %v1944_v21, %s1701_s9 }
0x124e   :  { %v1221_v11 = vpop.permute.xlu2 %1220 }
0x124f   :  { %v1223_v13 = vmul.f32 %v1221_v11, %v1204_v61 }
0x1250   :  { %v1158_v14 = vpop.permute.xlu1 %1157 }
0x1251   :  { %1160 = vst.msk [vmem:[#allocation4 + $0x7] sm:$0x1] %vm224_vm10, %v1158_v14  ;;  %1225 = vrot.lane.b32.xlu2 %v1223_v13, %s1701_s9 }
0x1256   :  { %v556_v12 = vpop.permute.xlu2 %555 }
0x1257   :  { %558 = vst.msk [vmem:[#allocation4 + $0x5] sm:$0x1] %vm289_vm15, %v556_v12 }
0x1258   :  { %892 = vst.msk [vmem:[#allocation4 + $0x5] sm:$0x1] %vm224_vm10, %v1948_v22 }
0x125e   :  { %v958_v49 = vpop.permute.xlu2 %957 }
0x125f   :  { %960 = vst.msk [vmem:[#allocation4 + $0x2] sm:$0x1] %vm289_vm15, %v958_v49 }
0x12ab   :  { %v1226_v21 = vpop.permute.xlu2 %1225 }
0x12ac   :  { %1228 = vst.msk [vmem:[#allocation4] sm:$0x1] %vm289_vm15, %v1226_v21 }
0x12b3   :  { %v1229_v17 = vld [vmem:[#allocation4] sm:$0xff] }
0x12b4   :  { %v1230_v16 = vpack.c.bf16 %v1229_v17, %v1229_v17 }
0x12b6   :  { %1382 = vmatmul.msk.bf16.vlgmr.msrb.gmra.mxu3 %vm129_vm0, %v1230_v16 }
0x1339   :  { %v1263_v19 = vpop.f32.mrf.mxu3 }
0x133a   :  { %v1264_v22 = vadd.f32 %v1403_v18, %v1263_v19 }
0x133c   :  { %1533 = vtanh.f32 %v1264_v22 }
0x1341   :  { %v1265_v23 = vpop.f32.mrf.mxu3 }
0x1342   :  { %v1534_v24 = vpop.eup %1533 }
0x1343   :  { %v1272_v25 = vmul.f32 %v1534_v24, %v1404_v20 }
0x1345   :  { %v1273_v26 = vsel %vm129_vm0, %v1272_v25, 0.0 }
0x1346   :  { %1274 = vadd.xlane.f32.xlu0 %v1273_v26 }
0x13b9   :  { %v1275_v27 = vpop.xlane.xlu0 %1274 }
0x13ba   :  { %v1276_v28 = vrot.slane %v1275_v27, 4 }
0x13bc   :  { %v1277_v31 = vmax.f32 %v1275_v27, %v1276_v28 }
0x13be   :  { %v1278_v32 = vrot.slane %v1277_v31, 2 }
0x13c0   :  { %v1279_v33 = vmax.f32 %v1277_v31, %v1278_v32 }
0x13c2   :  { %v1280_v34 = vrot.slane %v1279_v33, 1 }
0x13c4   :  { %v1281_v35 = vmax.f32 %v1279_v33, %v1280_v34 }
0x13c6   :  { %v1282_v36 = vsub.f32 %v1275_v27, %v1281_v35 }
0x13c8   :  { %v1283_v37 = vmul.f32 1.442695, %v1282_v36 }
0x13ca   :  { %1535 = vpow2.f32 %v1283_v37 }
0x13d0   :  { %v1536_v39 = vpop.eup %1535 }
0x13d1   :  { %v1285_v40 = vrot.slane %v1536_v39, 4 }
0x13d3   :  { %v1286_v41 = vadd.f32 %v1536_v39, %v1285_v40 }
0x13d5   :  { %v1287_v42 = vrot.slane %v1286_v41, 2 }
0x13d7   :  { %v1288_v44 = vadd.f32 %v1287_v42, %v1286_v41 }
0x13d9   :  { %v1289_v45 = vrot.slane %v1288_v44, 1 }
0x13db   :  { %v1290_v46 = vadd.f32 %v1289_v45, %v1288_v44 }
0x13dd   :  { %1537 = vrcp.f32 %v1290_v46  ;;  %v1302_v51 = vand.u32 2147483648, %v1290_v46  ;;  %v1300_v53 = vand.u32 2147483647, %v1290_v46  ;;  %vm1296_vm1 = vweird.f32 %v1290_v46 }
0x13df   :  { %v1303_v54 = vor.u32 1.1754944e-38, %v1302_v51  ;;  %vm1301_vm3 = vcmp.eq.f32.partialorder %v1300_v53, 8.507059e+37 }
0x13e3   :  { %v1538_v47 = vpop.eup %1537 }
0x13e4   :  { %v1292_v48 = vmul.f32 %v1538_v47, %v1290_v46  ;;  %vm1297_vm10 = vweird.f32 %v1538_v47 }
0x13e5   :  { %vm1298_vm2 = vmor %vm1296_vm1, %vm1297_vm10 }
0x13e6   :  { %v1293_v50 = vsub.f32 1.0, %v1292_v48 }
0x13e8   :  { %v1294_v52 = vmul.f32 %v1538_v47, %v1293_v50 }
0x13ea   :  { %v1295_v43 = vadd.f32 %v1538_v47, %v1294_v52 }
0x13ec   :  { %v1299_v56 = vsel %vm1298_vm2, %v1538_v47, %v1295_v43 }
0x13ed   :  { %v1304_v57 = vsel %vm1301_vm3, %v1303_v54, %v1299_v56 }
0x13ee   :  { %v1305_v2 = vmul.f32 %v1536_v39, %v1304_v57 }
0x13f0   :  { %v1306_v58 = vmul.f32 %v1305_v2, %v1229_v17 }
0x13f2   :  { %v1307_v3 = vsel %vm129_vm0, %v1306_v58, 0.0 }
0x13f3   :  { %v1308_v59 = vrot.slane %v1307_v3, 4 }
0x13f5   :  { %v1309_v60 = vadd.f32 %v1308_v59, %v1307_v3 }
0x13f7   :  { %v1310_v4 = vrot.slane %v1309_v60, 2 }
0x13f9   :  { %v1311_v6 = vadd.f32 %v1310_v4, %v1309_v60 }
0x13fb   :  { %v1312_v61 = vrot.slane %v1311_v6, 1 }
0x13fd   :  { %v1313_v62 = vadd.f32 %v1312_v61, %v1311_v6 }
0x13ff   :  { %1315 = vst.msk [vmem:[#allocation14] sm:$0x1] %vm1314_vm4, %v1313_v62 }
0x1400   :  { %1326 = dma.vmem_to_hbm [thread:$0]  %s1322_s7, 16, %s1324_s1, [#allocation7]  }
0x1401   :  { %1689 = dma.done.wait [#allocation7], 16  }
0x1402   :  { %1690 = vsyncadd [#allocation7], 4294967280 }
0x1403   :  { %1331 = vsyncpa [#allocation6], 1 }
0x1404   :  { %1332 = vsyncpa [#allocation9], 1 }
0x1405   :  { %1333 = vsyncpa [#allocation12], 1 }
0x1406   :  { %1334 = vsyncpa [#allocation7], 1 }

</bundles_post_ra>
